<compile_context>
chip_gen: v5e
topology: v5e:2x2
jax: 0.10.0
libtpu: 0.0.40
codegen_flags: <defaults>
</compile_context>

<pallas_src>
import functools

import jax
import jax.numpy as jnp
from jax.experimental import pallas as pl
from jax.experimental.pallas import tpu as pltpu  # noqa: F401  (kept for parity)

# ----------------------------- model dimensions -----------------------------
B = 2          # n_trials
T_TOTAL = 10   # total time bins in y_obs
T_ENC = 8      # n_time_bins_enc
N_OBS = 32     # n_neurons_obs
N_ENCN = 24    # n_neurons_enc (only used by .predict; kept for parity)
L = 8          # n_latents
RY = 4         # rank of local-encoder precision factor
RB = 4         # rank of backward-encoder precision factor
H_LE = 32      # local encoder hidden width
H_GRU = 16     # backward GRU hidden width
N_SAMPLES = 3
DELTA = 0.01   # Poisson bin width

M = B * T_ENC                     # flattened rows, t-major: row = t*B + b
D_LE = L + L * RY                 # local-encoder slab width  (k_y | K_y_flat) = 40
D_BE = L + L * RB                 # backward-encoder slab width (k_b | K_b_flat) = 40
D_K = L * RY + L * RB             # concatenated precision-factor width = 64
BIAS_W = max(H_LE, D_LE, 3 * H_GRU, D_BE, N_OBS)   # 48 (bias-pack row width)


# ------------------------------ fused kernel --------------------------------
def _fused_forward_kernel(l2_c, n_samples,
                          # ---- inputs ----
                          yy_ref, masks_ref, eps_ref,
                          w1_ref, w2_ref, wi_ref, wh_ref, wp_ref,
                          ct_ref, g_ref, bias_ref,
                          # ---- outputs ----
                          z_ref, stats_ref, loss_ref):
    # ---------------- unpack packed inputs (static slices, VMEM-resident) ---
    yy = yy_ref[...]                        # (M, 2N): [y_raw | y_in]
    y2 = yy[:, :N_OBS]                      # raw spikes (for ELL)
    yin2 = yy[:, N_OBS:]                    # coBPS-masked/scaled encoder input
    masks = masks_ref[...]                  # (M, 3): [t_mask_a | t_mask_b | t_mask_apb]
    ma = masks[:, 0:1]
    mb = masks[:, 1:2]
    mapb = masks[:, 2:3]
    bias = bias_ref[...]                    # (5, BIAS_W), zero-padded rows
    b1 = bias[0:1, :H_LE]
    b2 = bias[1:2, :D_LE]
    bi = bias[2:3, :3 * H_GRU]              # gru_bi + gru_bh (folded wrapper-side)
    bp = bias[3:4, :D_BE]
    brow = bias[4:5, :N_OBS]                # log(delta) + readout bias

    # ---------------- local encoder (all B*T rows in one MXU pass) ----------
    h1 = jnp.dot(yin2, w1_ref[...], preferred_element_type=jnp.float32) + b1
    h1 = h1 * jax.nn.sigmoid(h1)            # SiLU
    o_y = jnp.dot(h1, w2_ref[...], preferred_element_type=jnp.float32) + b2
    # Reference applies t_mask_a to BOTH k_y and K_y -> scale the whole slab.
    a_y = ma * o_y                          # (M, D_LE): [k_y | K_y_flat]

    # ---------------- backward encoder: reverse-time GRU --------------------
    # TODO(synk): xfads' backward encoder shifts outputs by one bin (time t
    # encodes t+1..T); the injected module isn't given, so no shift is applied.
    # Input projection hoisted out of the recurrence: one matmul for all T.
    gi_all = jnp.dot(a_y, wi_ref[...], preferred_element_type=jnp.float32) + bi
    wh = wh_ref[...]
    h_t = jnp.zeros((B, H_GRU), jnp.float32)
    h_list = [None] * T_ENC
    # Fully unrolled reverse-time recurrence; only h @ W_h stays serial.
    # Hidden states stay in vregs (no VMEM scratch round-trip).
    for t in range(T_ENC - 1, -1, -1):
        gi = gi_all[t * B:(t + 1) * B, :]   # (B, 3H): t-major contiguous rows
        gh = jnp.dot(h_t, wh, preferred_element_type=jnp.float32)
        rz = jax.nn.sigmoid(gi[:, :2 * H_GRU] + gh[:, :2 * H_GRU])   # fused r,z
        r = rz[:, :H_GRU]
        zg = rz[:, H_GRU:]
        n = jnp.tanh(gi[:, 2 * H_GRU:] + r * gh[:, 2 * H_GRU:])
        h_t = (1.0 - zg) * n + zg * h_t
        h_list[t] = h_t
    h_all = jnp.concatenate(h_list, axis=0)          # (M, H_GRU), t-major
    # Output projection hoisted: one matmul over all timesteps.
    o_b = jnp.dot(h_all, wp_ref[...], preferred_element_type=jnp.float32) + bp
    a_b = mb * o_b                                   # (M, D_BE): [k_b | K_b_flat]

    # ---------------- low-rank pseudo filter --------------------------------
    # TODO(synk): the exact xfads dynamics-driven low-rank nonlinear filter is
    # an injected module not provided; this is a diagonal + low-rank-precision
    # Gaussian pseudo-filter with the same input/output shapes.
    k = mapb * (a_b[:, :L] + a_y[:, :L])             # k = k_b + k_y (masked)
    kcat = jnp.concatenate([a_y[:, L:], a_b[:, L:]], axis=1)   # (M, D_K)
    # Per-latent sum of squares via a single precomputed 0/1 block-diag matmul.
    ss = jnp.dot(kcat * kcat, g_ref[...], preferred_element_type=jnp.float32)  # (M, L)
    prec = 1.0 + mapb * ss                           # precision diag
    v = 1.0 / prec
    m = v * k
    std = jnp.sqrt(v)
    kl = 0.5 * jnp.sum(m * m + v - jnp.log(v) - 1.0, axis=-1, keepdims=True)   # (M, 1)

    # ---------------- sampling + Poisson ELL (batched over samples) ---------
    # log_rate = log(delta) + z @ C^T + bias  (log(delta) folded into brow).
    eps = eps_ref[...]                               # (S*M, L), sample-major
    m_rep = jnp.concatenate([m] * n_samples, axis=0)
    std_rep = jnp.concatenate([std] * n_samples, axis=0)
    z_all = m_rep + std_rep * eps                    # (S*M, L), reparameterized
    z_ref[...] = z_all                               # one lane-contiguous store
    lr = jnp.dot(z_all, ct_ref[...], preferred_element_type=jnp.float32) + brow
    y_rep = jnp.concatenate([y2] * n_samples, axis=0)
    # Poisson ELL (constant -log(y!) omitted, as in xfads get_ell)
    ell_rows = jnp.sum(y_rep * lr - jnp.exp(lr), axis=-1, keepdims=True)  # (S*M, 1)
    ell = ell_rows[:M]
    for s in range(1, n_samples):                    # static, tiny adds
        ell = ell + ell_rows[s * M:(s + 1) * M]
    ell = ell * (1.0 / n_samples)                    # mean over samples, (M, 1)

    # ---------------- packed stats slab + scalar loss ------------------------
    stats_ref[...] = jnp.concatenate([m, kl, ell], axis=1)       # (M, L+2)
    # loss = (kl - ell).sum(time).mean(trials) + l2_C * sum(C^2)
    tot = jnp.sum(kl - ell, axis=0, keepdims=True)               # (1, 1)
    ct = ct_ref[...]
    l2 = jnp.sum(jnp.sum(ct * ct, axis=1, keepdims=True), axis=0, keepdims=True)
    loss_ref[...] = tot * (1.0 / B) + l2_c * l2


def fused_forward(yy, masks, eps, weights, bias_pack, n_samples, l2_c):
    kern = functools.partial(_fused_forward_kernel, l2_c, n_samples)
    return pl.pallas_call(
        kern,
        out_shape=(jax.ShapeDtypeStruct((n_samples * M, L), jnp.float32),   # z slab
                   jax.ShapeDtypeStruct((M, L + 2), jnp.float32),           # [m|kl|ell]
                   jax.ShapeDtypeStruct((1, 1), jnp.float32)),              # loss
    )(yy, masks, eps, *weights, bias_pack)


# ------------------------------- parameters ---------------------------------
def init_params(key):
    ks = jax.random.split(key, 8)

    def lin(k, fan_in, shape):
        return jax.random.normal(k, shape, jnp.float32) / jnp.sqrt(fan_in)

    return {
        'le_w1': lin(ks[0], N_OBS, (N_OBS, H_LE)),
        'le_b1': jnp.zeros((1, H_LE), jnp.float32),
        'le_w2': lin(ks[1], H_LE, (H_LE, D_LE)),
        'le_b2': jnp.zeros((1, D_LE), jnp.float32),
        'gru_wi': lin(ks[2], D_LE, (D_LE, 3 * H_GRU)),
        'gru_bi': jnp.zeros((1, 3 * H_GRU), jnp.float32),
        'gru_wh': lin(ks[3], H_GRU, (H_GRU, 3 * H_GRU)),
        'gru_bh': jnp.zeros((1, 3 * H_GRU), jnp.float32),
        'be_wp': lin(ks[4], H_GRU, (H_GRU, D_BE)),
        'be_bp': jnp.zeros((1, D_BE), jnp.float32),
        'readout_C': lin(ks[5], L, (N_OBS, L)),   # torch Linear weight (out, in)
        'readout_b': jnp.zeros((N_OBS,), jnp.float32),
    }


# ------------------------------ forward pass ---------------------------------
def lr_ssm_cobps_forward(params, y_obs, n_samples, key,
                         p_mask_apb=0.0, p_mask_a=0.0, p_mask_b=0.0,
                         p_mask_y_in=0.0, l2_C=0.1):
    n_trials, _, n_neurons_obs = y_obs.shape
    y = y_obs[:, :T_ENC, :]                             # (B, T_ENC, N_OBS)

    k_a, k_bk, k_apb, k_yk, k_eps = jax.random.split(key, 5)
    # torch.bernoulli((1-p) * ones) equivalents; with p=0 these are all-ones.
    t_mask_a = jax.random.bernoulli(k_a, 1.0 - p_mask_a,
                                    (n_trials, T_ENC)).astype(jnp.float32)
    t_mask_b = jax.random.bernoulli(k_bk, 1.0 - p_mask_b,
                                    (n_trials, T_ENC)).astype(jnp.float32)
    t_mask_apb = jax.random.bernoulli(k_apb, 1.0 - p_mask_apb,
                                      (n_trials, T_ENC)).astype(jnp.float32)
    # NOTE: (n_trials, 1, n_neurons) — broadcast over time (coBPS variant).
    t_mask_y_in = jax.random.bernoulli(k_yk, 1.0 - p_mask_y_in,
                                       (n_trials, 1, n_neurons_obs)).astype(jnp.float32)

    # coBPS input scaling; reference divides by (1 - p_mask_y_in) unguarded.
    y_in = t_mask_y_in * y / (1.0 - p_mask_y_in)

    # t-major row layout (row = t*B + b): per-GRU-step rows are contiguous.
    # All wrapper-side reshapes/transposes are on tiny arrays (negligible).
    y_t = jnp.transpose(y, (1, 0, 2)).reshape(M, N_OBS)
    yin_t = jnp.transpose(y_in, (1, 0, 2)).reshape(M, N_OBS)
    yy = jnp.concatenate([y_t, yin_t], axis=1)          # (M, 2N): one input DMA

    masks = jnp.stack([t_mask_a.T.reshape(M),
                       t_mask_b.T.reshape(M),
                       t_mask_apb.T.reshape(M)], axis=1)    # (M, 3): one input DMA

    # TODO(synk): eps could be generated in-kernel with pltpu.prng_seed +
    # pltpu.stateful_normal to drop this (tiny) input; kept explicit for
    # deterministic reproducibility with jax.random.
    eps = jax.random.normal(k_eps, (n_samples * M, L), jnp.float32)

    # Pack all small biases into one (5, BIAS_W) slab; gru_bh folded into
    # gru_bi (bias-folded GRU variant; identical with zero-init biases).
    def pad(v):
        v = v.reshape(-1)
        return jnp.pad(v, (0, BIAS_W - v.shape[0]))
    bias_pack = jnp.stack([pad(params['le_b1']),
                           pad(params['le_b2']),
                           pad(params['gru_bi'] + params['gru_bh']),
                           pad(params['be_bp']),
                           pad(jnp.log(DELTA) + params['readout_b'])], axis=0)

    ct = jnp.transpose(params['readout_C'])             # (L, N_OBS)

    # Precomputed 0/1 block-diagonal group-sum matrix for [K_y | K_b] sq-sums.
    g_y = (jnp.arange(L * RY)[:, None] // RY == jnp.arange(L)[None, :]).astype(jnp.float32)
    g_b = (jnp.arange(L * RB)[:, None] // RB == jnp.arange(L)[None, :]).astype(jnp.float32)
    G = jnp.concatenate([g_y, g_b], axis=0)             # (D_K, L)

    weights = (params['le_w1'], params['le_w2'], params['gru_wi'],
               params['gru_wh'], params['be_wp'], ct, G)

    z2, stats2, loss_core = fused_forward(yy, masks, eps, weights, bias_pack,
                                          n_samples, l2_C)

    # Undo the t-major layout on the tiny outputs (wrapper-side).
    m_f = stats2[:, :L].reshape(T_ENC, n_trials, L).transpose(1, 0, 2)
    kl = stats2[:, L].reshape(T_ENC, n_trials).T
    ell = stats2[:, L + 1].reshape(T_ENC, n_trials).T
    z_enc = z2.reshape(n_samples, T_ENC, n_trials, L).transpose(0, 2, 1, 3)
    loss_s = loss_core[0, 0]

    stats = {'kl': kl, 'ell': ell, 't_mask_y_in': t_mask_y_in, 'm_f': m_f}
    return loss_s, z_enc, stats


# ---------------------------------- main -------------------------------------
if __name__ == "__main__":
    key = jax.random.PRNGKey(0)
    pkey, ykey, fkey = jax.random.split(key, 3)

    params = init_params(pkey)
    y_obs = jax.random.poisson(ykey, 1.0, (B, T_TOTAL, N_OBS)).astype(jnp.float32)

    fwd = jax.jit(lambda p, y, k: lr_ssm_cobps_forward(p, y, N_SAMPLES, k))
    loss, z_enc, stats = fwd(params, y_obs, fkey)
    jax.block_until_ready((loss, z_enc, stats))

    assert loss.shape == ()
    assert bool(jnp.isfinite(loss))
    assert z_enc.shape == (N_SAMPLES, B, T_ENC, L)
    assert stats['kl'].shape == (B, T_ENC)
    assert stats['ell'].shape == (B, T_ENC)
    assert stats['m_f'].shape == (B, T_ENC, L)
    assert stats['t_mask_y_in'].shape == (B, 1, N_OBS)
    print("KERNEL_OK")
</pallas_src>

<mosaic_0001>
module attributes {stable_mosaic.version = 11 : i64} {
  func.func @_fused_forward_kernel(%arg0: memref<16x64xf32, #tpu.memory_space<vmem>>, %arg1: memref<16x3xf32, #tpu.memory_space<vmem>>, %arg2: memref<48x8xf32, #tpu.memory_space<vmem>>, %arg3: memref<32x32xf32, #tpu.memory_space<vmem>>, %arg4: memref<32x40xf32, #tpu.memory_space<vmem>>, %arg5: memref<40x48xf32, #tpu.memory_space<vmem>>, %arg6: memref<16x48xf32, #tpu.memory_space<vmem>>, %arg7: memref<16x40xf32, #tpu.memory_space<vmem>>, %arg8: memref<8x32xf32, #tpu.memory_space<vmem>>, %arg9: memref<64x8xf32, #tpu.memory_space<vmem>>, %arg10: memref<5x48xf32, #tpu.memory_space<vmem>>, %arg11: memref<48x8xf32, #tpu.memory_space<vmem>>, %arg12: memref<16x10xf32, #tpu.memory_space<vmem>>, %arg13: memref<1x1xf32, #tpu.memory_space<vmem>>) attributes {dimension_semantics = [], scalar_prefetch = 0 : i64, scratch_operands = 0 : i64, tpu.core_type = #tpu.core_type<tc>} {
    %c0 = arith.constant 0 : index
    %c0_0 = arith.constant 0 : index
    %0 = vector.load %arg0[%c0, %c0_0] : memref<16x64xf32, #tpu.memory_space<vmem>>, vector<16x64xf32>
    %1 = vector.extract_strided_slice %0 {offsets = [0, 0], sizes = [16, 32], strides = [1, 1]} : vector<16x64xf32> to vector<16x32xf32>
    %2 = vector.extract_strided_slice %0 {offsets = [0, 32], sizes = [16, 32], strides = [1, 1]} : vector<16x64xf32> to vector<16x32xf32>
    %c0_1 = arith.constant 0 : index
    %c0_2 = arith.constant 0 : index
    %3 = vector.load %arg1[%c0_1, %c0_2] : memref<16x3xf32, #tpu.memory_space<vmem>>, vector<16x3xf32>
    %4 = vector.extract_strided_slice %3 {offsets = [0, 0], sizes = [16, 1], strides = [1, 1]} : vector<16x3xf32> to vector<16x1xf32>
    %5 = vector.extract_strided_slice %3 {offsets = [0, 1], sizes = [16, 1], strides = [1, 1]} : vector<16x3xf32> to vector<16x1xf32>
    %6 = vector.extract_strided_slice %3 {offsets = [0, 2], sizes = [16, 1], strides = [1, 1]} : vector<16x3xf32> to vector<16x1xf32>
    %c0_3 = arith.constant 0 : index
    %c0_4 = arith.constant 0 : index
    %7 = vector.load %arg10[%c0_3, %c0_4] : memref<5x48xf32, #tpu.memory_space<vmem>>, vector<5x48xf32>
    %8 = vector.extract_strided_slice %7 {offsets = [0, 0], sizes = [1, 32], strides = [1, 1]} : vector<5x48xf32> to vector<1x32xf32>
    %9 = vector.extract_strided_slice %7 {offsets = [1, 0], sizes = [1, 40], strides = [1, 1]} : vector<5x48xf32> to vector<1x40xf32>
    %10 = vector.extract_strided_slice %7 {offsets = [2, 0], sizes = [1, 48], strides = [1, 1]} : vector<5x48xf32> to vector<1x48xf32>
    %11 = vector.extract_strided_slice %7 {offsets = [3, 0], sizes = [1, 40], strides = [1, 1]} : vector<5x48xf32> to vector<1x40xf32>
    %12 = vector.extract_strided_slice %7 {offsets = [4, 0], sizes = [1, 32], strides = [1, 1]} : vector<5x48xf32> to vector<1x32xf32>
    %c0_5 = arith.constant 0 : index
    %c0_6 = arith.constant 0 : index
    %13 = vector.load %arg3[%c0_5, %c0_6] : memref<32x32xf32, #tpu.memory_space<vmem>>, vector<32x32xf32>
    %cst = arith.constant dense<0.000000e+00> : vector<16x32xf32>
    %14 = tpu.matmul %2, %13, %cst {dimension_numbers = #tpu.dot_dimension_numbers<[1], [0], [0], [1], [0, 0, 1, 1], [], []>} : vector<16x32xf32>, vector<32x32xf32>, vector<16x32xf32> -> vector<16x32xf32>
    %15 = vector.broadcast %8 : vector<1x32xf32> to vector<16x32xf32>
    %16 = arith.addf %14, %15 : vector<16x32xf32>
    %17 = arith.negf %16 : vector<16x32xf32>
    %18 = math.exp %17 : vector<16x32xf32>
    %cst_7 = arith.constant 1.000000e+00 : f32
    %19 = vector.broadcast %cst_7 : f32 to vector<16x32xf32>
    %20 = arith.addf %19, %18 : vector<16x32xf32>
    %21 = arith.divf %19, %20 : vector<16x32xf32>
    %22 = arith.mulf %16, %21 : vector<16x32xf32>
    %c0_8 = arith.constant 0 : index
    %c0_9 = arith.constant 0 : index
    %23 = vector.load %arg4[%c0_8, %c0_9] : memref<32x40xf32, #tpu.memory_space<vmem>>, vector<32x40xf32>
    %cst_10 = arith.constant dense<0.000000e+00> : vector<16x40xf32>
    %24 = tpu.matmul %22, %23, %cst_10 {dimension_numbers = #tpu.dot_dimension_numbers<[1], [0], [0], [1], [0, 0, 1, 1], [], []>} : vector<16x32xf32>, vector<32x40xf32>, vector<16x40xf32> -> vector<16x40xf32>
    %25 = vector.broadcast %9 : vector<1x40xf32> to vector<16x40xf32>
    %26 = arith.addf %24, %25 : vector<16x40xf32>
    %27 = vector.broadcast %4 : vector<16x1xf32> to vector<16x40xf32>
    %28 = arith.mulf %27, %26 : vector<16x40xf32>
    %c0_11 = arith.constant 0 : index
    %c0_12 = arith.constant 0 : index
    %29 = vector.load %arg5[%c0_11, %c0_12] : memref<40x48xf32, #tpu.memory_space<vmem>>, vector<40x48xf32>
    %cst_13 = arith.constant dense<0.000000e+00> : vector<16x48xf32>
    %30 = tpu.matmul %28, %29, %cst_13 {dimension_numbers = #tpu.dot_dimension_numbers<[1], [0], [0], [1], [0, 0, 1, 1], [], []>} : vector<16x40xf32>, vector<40x48xf32>, vector<16x48xf32> -> vector<16x48xf32>
    %31 = vector.broadcast %10 : vector<1x48xf32> to vector<16x48xf32>
    %32 = arith.addf %30, %31 : vector<16x48xf32>
    %c0_14 = arith.constant 0 : index
    %c0_15 = arith.constant 0 : index
    %33 = vector.load %arg6[%c0_14, %c0_15] : memref<16x48xf32, #tpu.memory_space<vmem>>, vector<16x48xf32>
    %cst_16 = arith.constant 0.000000e+00 : f32
    %34 = vector.broadcast %cst_16 : f32 to vector<2x16xf32>
    %35 = vector.extract_strided_slice %32 {offsets = [14, 0], sizes = [2, 48], strides = [1, 1]} : vector<16x48xf32> to vector<2x48xf32>
    %cst_17 = arith.constant dense<0.000000e+00> : vector<2x48xf32>
    %36 = tpu.matmul %34, %33, %cst_17 {dimension_numbers = #tpu.dot_dimension_numbers<[1], [0], [0], [1], [0, 0, 1, 1], [], []>} : vector<2x16xf32>, vector<16x48xf32>, vector<2x48xf32> -> vector<2x48xf32>
    %37 = vector.extract_strided_slice %35 {offsets = [0, 0], sizes = [2, 32], strides = [1, 1]} : vector<2x48xf32> to vector<2x32xf32>
    %38 = vector.extract_strided_slice %36 {offsets = [0, 0], sizes = [2, 32], strides = [1, 1]} : vector<2x48xf32> to vector<2x32xf32>
    %39 = arith.addf %37, %38 : vector<2x32xf32>
    %40 = arith.negf %39 : vector<2x32xf32>
    %41 = math.exp %40 : vector<2x32xf32>
    %cst_18 = arith.constant 1.000000e+00 : f32
    %42 = vector.broadcast %cst_18 : f32 to vector<2x32xf32>
    %43 = arith.addf %42, %41 : vector<2x32xf32>
    %44 = arith.divf %42, %43 : vector<2x32xf32>
    %45 = vector.extract_strided_slice %44 {offsets = [0, 0], sizes = [2, 16], strides = [1, 1]} : vector<2x32xf32> to vector<2x16xf32>
    %46 = vector.extract_strided_slice %44 {offsets = [0, 16], sizes = [2, 16], strides = [1, 1]} : vector<2x32xf32> to vector<2x16xf32>
    %47 = vector.extract_strided_slice %35 {offsets = [0, 32], sizes = [2, 16], strides = [1, 1]} : vector<2x48xf32> to vector<2x16xf32>
    %48 = vector.extract_strided_slice %36 {offsets = [0, 32], sizes = [2, 16], strides = [1, 1]} : vector<2x48xf32> to vector<2x16xf32>
    %49 = arith.mulf %45, %48 : vector<2x16xf32>
    %50 = arith.addf %47, %49 : vector<2x16xf32>
    %51 = math.tanh %50 : vector<2x16xf32>
    %cst_19 = arith.constant 1.000000e+00 : f32
    %52 = vector.broadcast %cst_19 : f32 to vector<2x16xf32>
    %53 = arith.subf %52, %46 : vector<2x16xf32>
    %54 = arith.mulf %53, %51 : vector<2x16xf32>
    %55 = arith.mulf %46, %34 : vector<2x16xf32>
    %56 = arith.addf %54, %55 : vector<2x16xf32>
    %57 = vector.extract_strided_slice %32 {offsets = [12, 0], sizes = [2, 48], strides = [1, 1]} : vector<16x48xf32> to vector<2x48xf32>
    %cst_20 = arith.constant dense<0.000000e+00> : vector<2x48xf32>
    %58 = tpu.matmul %56, %33, %cst_20 {dimension_numbers = #tpu.dot_dimension_numbers<[1], [0], [0], [1], [0, 0, 1, 1], [], []>} : vector<2x16xf32>, vector<16x48xf32>, vector<2x48xf32> -> vector<2x48xf32>
    %59 = vector.extract_strided_slice %57 {offsets = [0, 0], sizes = [2, 32], strides = [1, 1]} : vector<2x48xf32> to vector<2x32xf32>
    %60 = vector.extract_strided_slice %58 {offsets = [0, 0], sizes = [2, 32], strides = [1, 1]} : vector<2x48xf32> to vector<2x32xf32>
    %61 = arith.addf %59, %60 : vector<2x32xf32>
    %62 = arith.negf %61 : vector<2x32xf32>
    %63 = math.exp %62 : vector<2x32xf32>
    %cst_21 = arith.constant 1.000000e+00 : f32
    %64 = vector.broadcast %cst_21 : f32 to vector<2x32xf32>
    %65 = arith.addf %64, %63 : vector<2x32xf32>
    %66 = arith.divf %64, %65 : vector<2x32xf32>
    %67 = vector.extract_strided_slice %66 {offsets = [0, 0], sizes = [2, 16], strides = [1, 1]} : vector<2x32xf32> to vector<2x16xf32>
    %68 = vector.extract_strided_slice %66 {offsets = [0, 16], sizes = [2, 16], strides = [1, 1]} : vector<2x32xf32> to vector<2x16xf32>
    %69 = vector.extract_strided_slice %57 {offsets = [0, 32], sizes = [2, 16], strides = [1, 1]} : vector<2x48xf32> to vector<2x16xf32>
    %70 = vector.extract_strided_slice %58 {offsets = [0, 32], sizes = [2, 16], strides = [1, 1]} : vector<2x48xf32> to vector<2x16xf32>
    %71 = arith.mulf %67, %70 : vector<2x16xf32>
    %72 = arith.addf %69, %71 : vector<2x16xf32>
    %73 = math.tanh %72 : vector<2x16xf32>
    %cst_22 = arith.constant 1.000000e+00 : f32
    %74 = vector.broadcast %cst_22 : f32 to vector<2x16xf32>
    %75 = arith.subf %74, %68 : vector<2x16xf32>
    %76 = arith.mulf %75, %73 : vector<2x16xf32>
    %77 = arith.mulf %68, %56 : vector<2x16xf32>
    %78 = arith.addf %76, %77 : vector<2x16xf32>
    %79 = vector.extract_strided_slice %32 {offsets = [10, 0], sizes = [2, 48], strides = [1, 1]} : vector<16x48xf32> to vector<2x48xf32>
    %cst_23 = arith.constant dense<0.000000e+00> : vector<2x48xf32>
    %80 = tpu.matmul %78, %33, %cst_23 {dimension_numbers = #tpu.dot_dimension_numbers<[1], [0], [0], [1], [0, 0, 1, 1], [], []>} : vector<2x16xf32>, vector<16x48xf32>, vector<2x48xf32> -> vector<2x48xf32>
    %81 = vector.extract_strided_slice %79 {offsets = [0, 0], sizes = [2, 32], strides = [1, 1]} : vector<2x48xf32> to vector<2x32xf32>
    %82 = vector.extract_strided_slice %80 {offsets = [0, 0], sizes = [2, 32], strides = [1, 1]} : vector<2x48xf32> to vector<2x32xf32>
    %83 = arith.addf %81, %82 : vector<2x32xf32>
    %84 = arith.negf %83 : vector<2x32xf32>
    %85 = math.exp %84 : vector<2x32xf32>
    %cst_24 = arith.constant 1.000000e+00 : f32
    %86 = vector.broadcast %cst_24 : f32 to vector<2x32xf32>
    %87 = arith.addf %86, %85 : vector<2x32xf32>
    %88 = arith.divf %86, %87 : vector<2x32xf32>
    %89 = vector.extract_strided_slice %88 {offsets = [0, 0], sizes = [2, 16], strides = [1, 1]} : vector<2x32xf32> to vector<2x16xf32>
    %90 = vector.extract_strided_slice %88 {offsets = [0, 16], sizes = [2, 16], strides = [1, 1]} : vector<2x32xf32> to vector<2x16xf32>
    %91 = vector.extract_strided_slice %79 {offsets = [0, 32], sizes = [2, 16], strides = [1, 1]} : vector<2x48xf32> to vector<2x16xf32>
    %92 = vector.extract_strided_slice %80 {offsets = [0, 32], sizes = [2, 16], strides = [1, 1]} : vector<2x48xf32> to vector<2x16xf32>
    %93 = arith.mulf %89, %92 : vector<2x16xf32>
    %94 = arith.addf %91, %93 : vector<2x16xf32>
    %95 = math.tanh %94 : vector<2x16xf32>
    %cst_25 = arith.constant 1.000000e+00 : f32
    %96 = vector.broadcast %cst_25 : f32 to vector<2x16xf32>
    %97 = arith.subf %96, %90 : vector<2x16xf32>
    %98 = arith.mulf %97, %95 : vector<2x16xf32>
    %99 = arith.mulf %90, %78 : vector<2x16xf32>
    %100 = arith.addf %98, %99 : vector<2x16xf32>
    %101 = vector.extract_strided_slice %32 {offsets = [8, 0], sizes = [2, 48], strides = [1, 1]} : vector<16x48xf32> to vector<2x48xf32>
    %cst_26 = arith.constant dense<0.000000e+00> : vector<2x48xf32>
    %102 = tpu.matmul %100, %33, %cst_26 {dimension_numbers = #tpu.dot_dimension_numbers<[1], [0], [0], [1], [0, 0, 1, 1], [], []>} : vector<2x16xf32>, vector<16x48xf32>, vector<2x48xf32> -> vector<2x48xf32>
    %103 = vector.extract_strided_slice %101 {offsets = [0, 0], sizes = [2, 32], strides = [1, 1]} : vector<2x48xf32> to vector<2x32xf32>
    %104 = vector.extract_strided_slice %102 {offsets = [0, 0], sizes = [2, 32], strides = [1, 1]} : vector<2x48xf32> to vector<2x32xf32>
    %105 = arith.addf %103, %104 : vector<2x32xf32>
    %106 = arith.negf %105 : vector<2x32xf32>
    %107 = math.exp %106 : vector<2x32xf32>
    %cst_27 = arith.constant 1.000000e+00 : f32
    %108 = vector.broadcast %cst_27 : f32 to vector<2x32xf32>
    %109 = arith.addf %108, %107 : vector<2x32xf32>
    %110 = arith.divf %108, %109 : vector<2x32xf32>
    %111 = vector.extract_strided_slice %110 {offsets = [0, 0], sizes = [2, 16], strides = [1, 1]} : vector<2x32xf32> to vector<2x16xf32>
    %112 = vector.extract_strided_slice %110 {offsets = [0, 16], sizes = [2, 16], strides = [1, 1]} : vector<2x32xf32> to vector<2x16xf32>
    %113 = vector.extract_strided_slice %101 {offsets = [0, 32], sizes = [2, 16], strides = [1, 1]} : vector<2x48xf32> to vector<2x16xf32>
    %114 = vector.extract_strided_slice %102 {offsets = [0, 32], sizes = [2, 16], strides = [1, 1]} : vector<2x48xf32> to vector<2x16xf32>
    %115 = arith.mulf %111, %114 : vector<2x16xf32>
    %116 = arith.addf %113, %115 : vector<2x16xf32>
    %117 = math.tanh %116 : vector<2x16xf32>
    %cst_28 = arith.constant 1.000000e+00 : f32
    %118 = vector.broadcast %cst_28 : f32 to vector<2x16xf32>
    %119 = arith.subf %118, %112 : vector<2x16xf32>
    %120 = arith.mulf %119, %117 : vector<2x16xf32>
    %121 = arith.mulf %112, %100 : vector<2x16xf32>
    %122 = arith.addf %120, %121 : vector<2x16xf32>
    %123 = vector.extract_strided_slice %32 {offsets = [6, 0], sizes = [2, 48], strides = [1, 1]} : vector<16x48xf32> to vector<2x48xf32>
    %cst_29 = arith.constant dense<0.000000e+00> : vector<2x48xf32>
    %124 = tpu.matmul %122, %33, %cst_29 {dimension_numbers = #tpu.dot_dimension_numbers<[1], [0], [0], [1], [0, 0, 1, 1], [], []>} : vector<2x16xf32>, vector<16x48xf32>, vector<2x48xf32> -> vector<2x48xf32>
    %125 = vector.extract_strided_slice %123 {offsets = [0, 0], sizes = [2, 32], strides = [1, 1]} : vector<2x48xf32> to vector<2x32xf32>
    %126 = vector.extract_strided_slice %124 {offsets = [0, 0], sizes = [2, 32], strides = [1, 1]} : vector<2x48xf32> to vector<2x32xf32>
    %127 = arith.addf %125, %126 : vector<2x32xf32>
    %128 = arith.negf %127 : vector<2x32xf32>
    %129 = math.exp %128 : vector<2x32xf32>
    %cst_30 = arith.constant 1.000000e+00 : f32
    %130 = vector.broadcast %cst_30 : f32 to vector<2x32xf32>
    %131 = arith.addf %130, %129 : vector<2x32xf32>
    %132 = arith.divf %130, %131 : vector<2x32xf32>
    %133 = vector.extract_strided_slice %132 {offsets = [0, 0], sizes = [2, 16], strides = [1, 1]} : vector<2x32xf32> to vector<2x16xf32>
    %134 = vector.extract_strided_slice %132 {offsets = [0, 16], sizes = [2, 16], strides = [1, 1]} : vector<2x32xf32> to vector<2x16xf32>
    %135 = vector.extract_strided_slice %123 {offsets = [0, 32], sizes = [2, 16], strides = [1, 1]} : vector<2x48xf32> to vector<2x16xf32>
    %136 = vector.extract_strided_slice %124 {offsets = [0, 32], sizes = [2, 16], strides = [1, 1]} : vector<2x48xf32> to vector<2x16xf32>
    %137 = arith.mulf %133, %136 : vector<2x16xf32>
    %138 = arith.addf %135, %137 : vector<2x16xf32>
    %139 = math.tanh %138 : vector<2x16xf32>
    %cst_31 = arith.constant 1.000000e+00 : f32
    %140 = vector.broadcast %cst_31 : f32 to vector<2x16xf32>
    %141 = arith.subf %140, %134 : vector<2x16xf32>
    %142 = arith.mulf %141, %139 : vector<2x16xf32>
    %143 = arith.mulf %134, %122 : vector<2x16xf32>
    %144 = arith.addf %142, %143 : vector<2x16xf32>
    %145 = vector.extract_strided_slice %32 {offsets = [4, 0], sizes = [2, 48], strides = [1, 1]} : vector<16x48xf32> to vector<2x48xf32>
    %cst_32 = arith.constant dense<0.000000e+00> : vector<2x48xf32>
    %146 = tpu.matmul %144, %33, %cst_32 {dimension_numbers = #tpu.dot_dimension_numbers<[1], [0], [0], [1], [0, 0, 1, 1], [], []>} : vector<2x16xf32>, vector<16x48xf32>, vector<2x48xf32> -> vector<2x48xf32>
    %147 = vector.extract_strided_slice %145 {offsets = [0, 0], sizes = [2, 32], strides = [1, 1]} : vector<2x48xf32> to vector<2x32xf32>
    %148 = vector.extract_strided_slice %146 {offsets = [0, 0], sizes = [2, 32], strides = [1, 1]} : vector<2x48xf32> to vector<2x32xf32>
    %149 = arith.addf %147, %148 : vector<2x32xf32>
    %150 = arith.negf %149 : vector<2x32xf32>
    %151 = math.exp %150 : vector<2x32xf32>
    %cst_33 = arith.constant 1.000000e+00 : f32
    %152 = vector.broadcast %cst_33 : f32 to vector<2x32xf32>
    %153 = arith.addf %152, %151 : vector<2x32xf32>
    %154 = arith.divf %152, %153 : vector<2x32xf32>
    %155 = vector.extract_strided_slice %154 {offsets = [0, 0], sizes = [2, 16], strides = [1, 1]} : vector<2x32xf32> to vector<2x16xf32>
    %156 = vector.extract_strided_slice %154 {offsets = [0, 16], sizes = [2, 16], strides = [1, 1]} : vector<2x32xf32> to vector<2x16xf32>
    %157 = vector.extract_strided_slice %145 {offsets = [0, 32], sizes = [2, 16], strides = [1, 1]} : vector<2x48xf32> to vector<2x16xf32>
    %158 = vector.extract_strided_slice %146 {offsets = [0, 32], sizes = [2, 16], strides = [1, 1]} : vector<2x48xf32> to vector<2x16xf32>
    %159 = arith.mulf %155, %158 : vector<2x16xf32>
    %160 = arith.addf %157, %159 : vector<2x16xf32>
    %161 = math.tanh %160 : vector<2x16xf32>
    %cst_34 = arith.constant 1.000000e+00 : f32
    %162 = vector.broadcast %cst_34 : f32 to vector<2x16xf32>
    %163 = arith.subf %162, %156 : vector<2x16xf32>
    %164 = arith.mulf %163, %161 : vector<2x16xf32>
    %165 = arith.mulf %156, %144 : vector<2x16xf32>
    %166 = arith.addf %164, %165 : vector<2x16xf32>
    %167 = vector.extract_strided_slice %32 {offsets = [2, 0], sizes = [2, 48], strides = [1, 1]} : vector<16x48xf32> to vector<2x48xf32>
    %cst_35 = arith.constant dense<0.000000e+00> : vector<2x48xf32>
    %168 = tpu.matmul %166, %33, %cst_35 {dimension_numbers = #tpu.dot_dimension_numbers<[1], [0], [0], [1], [0, 0, 1, 1], [], []>} : vector<2x16xf32>, vector<16x48xf32>, vector<2x48xf32> -> vector<2x48xf32>
    %169 = vector.extract_strided_slice %167 {offsets = [0, 0], sizes = [2, 32], strides = [1, 1]} : vector<2x48xf32> to vector<2x32xf32>
    %170 = vector.extract_strided_slice %168 {offsets = [0, 0], sizes = [2, 32], strides = [1, 1]} : vector<2x48xf32> to vector<2x32xf32>
    %171 = arith.addf %169, %170 : vector<2x32xf32>
    %172 = arith.negf %171 : vector<2x32xf32>
    %173 = math.exp %172 : vector<2x32xf32>
    %cst_36 = arith.constant 1.000000e+00 : f32
    %174 = vector.broadcast %cst_36 : f32 to vector<2x32xf32>
    %175 = arith.addf %174, %173 : vector<2x32xf32>
    %176 = arith.divf %174, %175 : vector<2x32xf32>
    %177 = vector.extract_strided_slice %176 {offsets = [0, 0], sizes = [2, 16], strides = [1, 1]} : vector<2x32xf32> to vector<2x16xf32>
    %178 = vector.extract_strided_slice %176 {offsets = [0, 16], sizes = [2, 16], strides = [1, 1]} : vector<2x32xf32> to vector<2x16xf32>
    %179 = vector.extract_strided_slice %167 {offsets = [0, 32], sizes = [2, 16], strides = [1, 1]} : vector<2x48xf32> to vector<2x16xf32>
    %180 = vector.extract_strided_slice %168 {offsets = [0, 32], sizes = [2, 16], strides = [1, 1]} : vector<2x48xf32> to vector<2x16xf32>
    %181 = arith.mulf %177, %180 : vector<2x16xf32>
    %182 = arith.addf %179, %181 : vector<2x16xf32>
    %183 = math.tanh %182 : vector<2x16xf32>
    %cst_37 = arith.constant 1.000000e+00 : f32
    %184 = vector.broadcast %cst_37 : f32 to vector<2x16xf32>
    %185 = arith.subf %184, %178 : vector<2x16xf32>
    %186 = arith.mulf %185, %183 : vector<2x16xf32>
    %187 = arith.mulf %178, %166 : vector<2x16xf32>
    %188 = arith.addf %186, %187 : vector<2x16xf32>
    %189 = vector.extract_strided_slice %32 {offsets = [0, 0], sizes = [2, 48], strides = [1, 1]} : vector<16x48xf32> to vector<2x48xf32>
    %cst_38 = arith.constant dense<0.000000e+00> : vector<2x48xf32>
    %190 = tpu.matmul %188, %33, %cst_38 {dimension_numbers = #tpu.dot_dimension_numbers<[1], [0], [0], [1], [0, 0, 1, 1], [], []>} : vector<2x16xf32>, vector<16x48xf32>, vector<2x48xf32> -> vector<2x48xf32>
    %191 = vector.extract_strided_slice %189 {offsets = [0, 0], sizes = [2, 32], strides = [1, 1]} : vector<2x48xf32> to vector<2x32xf32>
    %192 = vector.extract_strided_slice %190 {offsets = [0, 0], sizes = [2, 32], strides = [1, 1]} : vector<2x48xf32> to vector<2x32xf32>
    %193 = arith.addf %191, %192 : vector<2x32xf32>
    %194 = arith.negf %193 : vector<2x32xf32>
    %195 = math.exp %194 : vector<2x32xf32>
    %cst_39 = arith.constant 1.000000e+00 : f32
    %196 = vector.broadcast %cst_39 : f32 to vector<2x32xf32>
    %197 = arith.addf %196, %195 : vector<2x32xf32>
    %198 = arith.divf %196, %197 : vector<2x32xf32>
    %199 = vector.extract_strided_slice %198 {offsets = [0, 0], sizes = [2, 16], strides = [1, 1]} : vector<2x32xf32> to vector<2x16xf32>
    %200 = vector.extract_strided_slice %198 {offsets = [0, 16], sizes = [2, 16], strides = [1, 1]} : vector<2x32xf32> to vector<2x16xf32>
    %201 = vector.extract_strided_slice %189 {offsets = [0, 32], sizes = [2, 16], strides = [1, 1]} : vector<2x48xf32> to vector<2x16xf32>
    %202 = vector.extract_strided_slice %190 {offsets = [0, 32], sizes = [2, 16], strides = [1, 1]} : vector<2x48xf32> to vector<2x16xf32>
    %203 = arith.mulf %199, %202 : vector<2x16xf32>
    %204 = arith.addf %201, %203 : vector<2x16xf32>
    %205 = math.tanh %204 : vector<2x16xf32>
    %cst_40 = arith.constant 1.000000e+00 : f32
    %206 = vector.broadcast %cst_40 : f32 to vector<2x16xf32>
    %207 = arith.subf %206, %200 : vector<2x16xf32>
    %208 = arith.mulf %207, %205 : vector<2x16xf32>
    %209 = arith.mulf %200, %188 : vector<2x16xf32>
    %210 = arith.addf %208, %209 : vector<2x16xf32>
    %211 = tpu.concatenate %210, %188, %166, %144, %122, %100, %78, %56 in 0 : vector<2x16xf32>, vector<2x16xf32>, vector<2x16xf32>, vector<2x16xf32>, vector<2x16xf32>, vector<2x16xf32>, vector<2x16xf32>, vector<2x16xf32> -> vector<16x16xf32>
    %c0_41 = arith.constant 0 : index
    %c0_42 = arith.constant 0 : index
    %212 = vector.load %arg7[%c0_41, %c0_42] : memref<16x40xf32, #tpu.memory_space<vmem>>, vector<16x40xf32>
    %cst_43 = arith.constant dense<0.000000e+00> : vector<16x40xf32>
    %213 = tpu.matmul %211, %212, %cst_43 {dimension_numbers = #tpu.dot_dimension_numbers<[1], [0], [0], [1], [0, 0, 1, 1], [], []>} : vector<16x16xf32>, vector<16x40xf32>, vector<16x40xf32> -> vector<16x40xf32>
    %214 = vector.broadcast %11 : vector<1x40xf32> to vector<16x40xf32>
    %215 = arith.addf %213, %214 : vector<16x40xf32>
    %216 = vector.broadcast %5 : vector<16x1xf32> to vector<16x40xf32>
    %217 = arith.mulf %216, %215 : vector<16x40xf32>
    %218 = vector.extract_strided_slice %217 {offsets = [0, 0], sizes = [16, 8], strides = [1, 1]} : vector<16x40xf32> to vector<16x8xf32>
    %219 = vector.extract_strided_slice %28 {offsets = [0, 0], sizes = [16, 8], strides = [1, 1]} : vector<16x40xf32> to vector<16x8xf32>
    %220 = arith.addf %218, %219 : vector<16x8xf32>
    %221 = vector.broadcast %6 : vector<16x1xf32> to vector<16x8xf32>
    %222 = arith.mulf %221, %220 : vector<16x8xf32>
    %223 = vector.extract_strided_slice %28 {offsets = [0, 8], sizes = [16, 32], strides = [1, 1]} : vector<16x40xf32> to vector<16x32xf32>
    %224 = vector.extract_strided_slice %217 {offsets = [0, 8], sizes = [16, 32], strides = [1, 1]} : vector<16x40xf32> to vector<16x32xf32>
    %225 = tpu.concatenate %223, %224 in 1 : vector<16x32xf32>, vector<16x32xf32> -> vector<16x64xf32>
    %226 = arith.mulf %225, %225 : vector<16x64xf32>
    %c0_44 = arith.constant 0 : index
    %c0_45 = arith.constant 0 : index
    %227 = vector.load %arg9[%c0_44, %c0_45] : memref<64x8xf32, #tpu.memory_space<vmem>>, vector<64x8xf32>
    %cst_46 = arith.constant dense<0.000000e+00> : vector<16x8xf32>
    %228 = tpu.matmul %226, %227, %cst_46 {dimension_numbers = #tpu.dot_dimension_numbers<[1], [0], [0], [1], [0, 0, 1, 1], [], []>} : vector<16x64xf32>, vector<64x8xf32>, vector<16x8xf32> -> vector<16x8xf32>
    %229 = vector.broadcast %6 : vector<16x1xf32> to vector<16x8xf32>
    %230 = arith.mulf %229, %228 : vector<16x8xf32>
    %cst_47 = arith.constant 1.000000e+00 : f32
    %231 = vector.broadcast %cst_47 : f32 to vector<16x8xf32>
    %232 = arith.addf %231, %230 : vector<16x8xf32>
    %cst_48 = arith.constant 1.000000e+00 : f32
    %233 = vector.broadcast %cst_48 : f32 to vector<16x8xf32>
    %234 = arith.divf %233, %232 : vector<16x8xf32>
    %235 = arith.mulf %234, %222 : vector<16x8xf32>
    %236 = math.sqrt %234 : vector<16x8xf32>
    %237 = arith.mulf %235, %235 : vector<16x8xf32>
    %238 = arith.addf %237, %234 : vector<16x8xf32>
    %239 = math.log %234 : vector<16x8xf32>
    %240 = arith.subf %238, %239 : vector<16x8xf32>
    %cst_49 = arith.constant 1.000000e+00 : f32
    %241 = vector.broadcast %cst_49 : f32 to vector<16x8xf32>
    %242 = arith.subf %240, %241 : vector<16x8xf32>
    %cst_50 = arith.constant dense<0.000000e+00> : vector<16xf32>
    %243 = vector.multi_reduction <add>, %242, %cst_50 [1] : vector<16x8xf32> to vector<16xf32>
    %244 = vector.shape_cast %243 : vector<16xf32> to vector<16x1xf32>
    %cst_51 = arith.constant 5.000000e-01 : f32
    %245 = vector.broadcast %cst_51 : f32 to vector<16x1xf32>
    %246 = arith.mulf %245, %244 : vector<16x1xf32>
    %c0_52 = arith.constant 0 : index
    %c0_53 = arith.constant 0 : index
    %247 = vector.load %arg2[%c0_52, %c0_53] : memref<48x8xf32, #tpu.memory_space<vmem>>, vector<48x8xf32>
    %248 = tpu.concatenate %235, %235, %235 in 0 : vector<16x8xf32>, vector<16x8xf32>, vector<16x8xf32> -> vector<48x8xf32>
    %249 = tpu.concatenate %236, %236, %236 in 0 : vector<16x8xf32>, vector<16x8xf32>, vector<16x8xf32> -> vector<48x8xf32>
    %250 = arith.mulf %249, %247 : vector<48x8xf32>
    %251 = arith.addf %248, %250 : vector<48x8xf32>
    %c0_54 = arith.constant 0 : index
    %c0_55 = arith.constant 0 : index
    %252 = vector.load %arg11[%c0_54, %c0_55] : memref<48x8xf32, #tpu.memory_space<vmem>>, vector<48x8xf32>
    tpu.vector_store %arg11[%c0_54, %c0_55], %251 {strides = array<i32>} : memref<48x8xf32, #tpu.memory_space<vmem>>, vector<48x8xf32>,
    %c0_56 = arith.constant 0 : index
    %c0_57 = arith.constant 0 : index
    %253 = vector.load %arg8[%c0_56, %c0_57] : memref<8x32xf32, #tpu.memory_space<vmem>>, vector<8x32xf32>
    %cst_58 = arith.constant dense<0.000000e+00> : vector<48x32xf32>
    %254 = tpu.matmul %251, %253, %cst_58 {dimension_numbers = #tpu.dot_dimension_numbers<[1], [0], [0], [1], [0, 0, 1, 1], [], []>} : vector<48x8xf32>, vector<8x32xf32>, vector<48x32xf32> -> vector<48x32xf32>
    %255 = vector.broadcast %12 : vector<1x32xf32> to vector<48x32xf32>
    %256 = arith.addf %254, %255 : vector<48x32xf32>
    %257 = tpu.concatenate %1, %1, %1 in 0 : vector<16x32xf32>, vector<16x32xf32>, vector<16x32xf32> -> vector<48x32xf32>
    %258 = arith.mulf %257, %256 : vector<48x32xf32>
    %259 = math.exp %256 : vector<48x32xf32>
    %260 = arith.subf %258, %259 : vector<48x32xf32>
    %cst_59 = arith.constant dense<0.000000e+00> : vector<48xf32>
    %261 = vector.multi_reduction <add>, %260, %cst_59 [1] : vector<48x32xf32> to vector<48xf32>
    %262 = vector.shape_cast %261 : vector<48xf32> to vector<48x1xf32>
    %263 = vector.extract_strided_slice %262 {offsets = [0, 0], sizes = [16, 1], strides = [1, 1]} : vector<48x1xf32> to vector<16x1xf32>
    %264 = vector.extract_strided_slice %262 {offsets = [16, 0], sizes = [16, 1], strides = [1, 1]} : vector<48x1xf32> to vector<16x1xf32>
    %265 = arith.addf %263, %264 : vector<16x1xf32>
    %266 = vector.extract_strided_slice %262 {offsets = [32, 0], sizes = [16, 1], strides = [1, 1]} : vector<48x1xf32> to vector<16x1xf32>
    %267 = arith.addf %265, %266 : vector<16x1xf32>
    %cst_60 = arith.constant 0.333333343 : f32
    %268 = vector.broadcast %cst_60 : f32 to vector<16x1xf32>
    %269 = arith.mulf %267, %268 : vector<16x1xf32>
    %270 = tpu.concatenate %235, %246, %269 in 1 : vector<16x8xf32>, vector<16x1xf32>, vector<16x1xf32> -> vector<16x10xf32>
    %c0_61 = arith.constant 0 : index
    %c0_62 = arith.constant 0 : index
    %271 = vector.load %arg12[%c0_61, %c0_62] : memref<16x10xf32, #tpu.memory_space<vmem>>, vector<16x10xf32>
    tpu.vector_store %arg12[%c0_61, %c0_62], %270 {strides = array<i32>} : memref<16x10xf32, #tpu.memory_space<vmem>>, vector<16x10xf32>,
    %272 = arith.subf %246, %269 : vector<16x1xf32>
    %cst_63 = arith.constant dense<0.000000e+00> : vector<1xf32>
    %273 = vector.multi_reduction <add>, %272, %cst_63 [0] : vector<16x1xf32> to vector<1xf32>
    %274 = vector.shape_cast %273 : vector<1xf32> to vector<1x1xf32>
    %c0_64 = arith.constant 0 : index
    %c0_65 = arith.constant 0 : index
    %275 = vector.load %arg8[%c0_64, %c0_65] : memref<8x32xf32, #tpu.memory_space<vmem>>, vector<8x32xf32>
    %276 = arith.mulf %275, %275 : vector<8x32xf32>
    %cst_66 = arith.constant dense<0.000000e+00> : vector<8xf32>
    %277 = vector.multi_reduction <add>, %276, %cst_66 [1] : vector<8x32xf32> to vector<8xf32>
    %278 = vector.shape_cast %277 : vector<8xf32> to vector<8x1xf32>
    %cst_67 = arith.constant dense<0.000000e+00> : vector<1xf32>
    %279 = vector.multi_reduction <add>, %278, %cst_67 [0] : vector<8x1xf32> to vector<1xf32>
    %280 = vector.shape_cast %279 : vector<1xf32> to vector<1x1xf32>
    %cst_68 = arith.constant 5.000000e-01 : f32
    %281 = vector.broadcast %cst_68 : f32 to vector<1x1xf32>
    %282 = arith.mulf %274, %281 : vector<1x1xf32>
    %cst_69 = arith.constant 1.000000e-01 : f32
    %283 = vector.broadcast %cst_69 : f32 to vector<1x1xf32>
    %284 = arith.mulf %283, %280 : vector<1x1xf32>
    %285 = arith.addf %282, %284 : vector<1x1xf32>
    %c0_70 = arith.constant 0 : index
    %c0_71 = arith.constant 0 : index
    %286 = vector.load %arg13[%c0_70, %c0_71] : memref<1x1xf32, #tpu.memory_space<vmem>>, vector<1x1xf32>
    tpu.vector_store %arg13[%c0_70, %c0_71], %285 {strides = array<i32>} : memref<1x1xf32, #tpu.memory_space<vmem>>, vector<1x1xf32>,
    return
  }
}

</mosaic_0001>

<bundles_post_ra>
// kernel: squeeze.29
= control target key start
LH: loop header
LB: loop body
LE: loop exit
PB: predicated region body
PF: predicated region fallthrough
CT: control target
= control target key end

     0   :  { %s66_s8 = smov 122   ;;  %s67_s9 = smov 118   ;;  %vm7_vm0 = vcmask 15360   ;;  %s117_s0 = inlined_call_operand.vmem [shape: f32[16], index: 0, kind: input, shape index: {}]   ;;  %s118_s1 = inlined_call_operand.vmem [shape: f32[8,2], index: 1, kind: output, shape index: {}]  }
   0x1   :  { %v4_v0 = vld [vmem:[%s117_s0] sm:$0x1]  ;;  %s65_s0 = smov 126   ;;  %s68_s10 = smov 124  }
   0x2   :  { %5 = vst [vmem:[#allocation0] sm:$0x1] %v4_v0  ;;  %s69_s11 = smov 120   ;;  %s70_s12 = smov 116  }
   0x3   :  { %s71_s13 = smov 114  }
   0x9   :  { %v9_v1 = vld [vmem:[#allocation0] sm:$0x1]  }
   0xa   :  { %v21_v2 = vld [vmem:[#allocation0] sm:$0x1]   ;;  %10 = vrot.lane.b32.xlu0 %v9_v1, %s65_s0 }
   0xb   :  { %22 = vrot.lane.b32.xlu1 %v21_v2, %s66_s8  ;;  %v33_v3 = vld [vmem:[#allocation0] sm:$0x1]  }
   0xc   :  { %34 = vrot.lane.b32.xlu2 %v33_v3, %s67_s9  ;;  %v15_v4 = vld [vmem:[#allocation0] sm:$0x1]  }
   0xd   :  { %v27_v5 = vld [vmem:[#allocation0] sm:$0x1]  }
   0xe   :  { %v39_v6 = vld [vmem:[#allocation0] sm:$0x1]  }
   0xf   :  { %v45_v7 = vld [vmem:[#allocation0] sm:$0x1]  }
  0x10   :  { %v6_v8 = vld [vmem:[#allocation0] sm:$0x1]  }
  0x11   :  { %8 = vst.msk [vmem:[%s118_s1] sm:$0x1] %vm7_vm0, %v6_v8  }
  0x12   :  { %16 = vrot.lane.b32.xlu0 %v15_v4, %s68_s10 }
  0x13   :  { %28 = vrot.lane.b32.xlu1 %v27_v5, %s69_s11 }
  0x14   :  { %40 = vrot.lane.b32.xlu2 %v39_v6, %s70_s12 }
  0x1a   :  { %46 = vrot.lane.b32.xlu0 %v45_v7, %s71_s13 }
  0x66   :  { %v35_v9 = vpop.permute.xlu2 %34  }
  0x67   :  { %55 = vst.msk [vmem:[%s118_s1 + $0x5] sm:$0x1] %vm7_vm0, %v35_v9  }
  0x6e   :  { %v41_v10 = vpop.permute.xlu2 %40  }
  0x6f   :  { %56 = vst.msk [vmem:[%s118_s1 + $0x6] sm:$0x1] %vm7_vm0, %v41_v10  }
  0x7c   :  { %v11_v11 = vpop.permute.xlu0 %10  }
  0x7d   :  { %v23_v12 = vpop.permute.xlu1 %22   ;;  %51 = vst.msk [vmem:[%s118_s1 + $0x1] sm:$0x1] %vm7_vm0, %v11_v11  }
  0x7e   :  { %53 = vst.msk [vmem:[%s118_s1 + $0x3] sm:$0x1] %vm7_vm0, %v23_v12  }
  0x84   :  { %v17_v13 = vpop.permute.xlu0 %16  }
  0x85   :  { %v29_v14 = vpop.permute.xlu1 %28   ;;  %52 = vst.msk [vmem:[%s118_s1 + $0x2] sm:$0x1] %vm7_vm0, %v17_v13  }
  0x86   :  { %54 = vst.msk [vmem:[%s118_s1 + $0x4] sm:$0x1] %vm7_vm0, %v29_v14  }
  0x8c   :  { %v47_v15 = vpop.permute.xlu0 %46  }
  0x8d   :  { %57 = vst.msk [vmem:[%s118_s1 + $0x7] sm:$0x1] %vm7_vm0, %v47_v15  }

// kernel: _lambda_.1
= control target key start
LH: loop header
LB: loop body
LE: loop exit
PB: predicated region body
PF: predicated region fallthrough
CT: control target
= control target key end

     0   :  { %s1304_s29 = smov 96   ;;  %s1763_s0 = inlined_call_operand.vmem [shape: f32[16,64], index: 0, kind: input, shape index: {}]   ;;  %s1764_s1 = inlined_call_operand.vmem [shape: f32[16,3], index: 1, kind: input, shape index: {}]   ;;  %s1765_s2 = inlined_call_operand.vmem [shape: f32[48,8], index: 2, kind: input, shape index: {}]   ;;  %s1766_s3 = inlined_call_operand.vmem [shape: f32[32,32], index: 3, kind: input, shape index: {}]   ;;  %s1767_s4 = inlined_call_operand.vmem [shape: f32[32,40], index: 4, kind: input, shape index: {}]   ;;  %s1768_s5 = inlined_call_operand.vmem [shape: f32[40,48], index: 5, kind: input, shape index: {}]   ;;  %s1769_s6 = inlined_call_operand.vmem [shape: f32[16,48], index: 6, kind: input, shape index: {}]   ;;  %s1770_s7 = inlined_call_operand.vmem [shape: f32[16,40], index: 7, kind: input, shape index: {}]   ;;  %s1771_s8 = inlined_call_operand.vmem [shape: f32[8,32], index: 8, kind: input, shape index: {}]   ;;  %s1772_s9 = inlined_call_operand.vmem [shape: f32[64,8], index: 9, kind: input, shape index: {}]   ;;  %s1773_s10 = inlined_call_operand.vmem [shape: f32[5,48], index: 10, kind: input, shape index: {}]   ;;  %s1774_s11 = inlined_call_operand.vmem [shape: f32[48,8], index: 11, kind: output, shape index: {0}]   ;;  %s1775_s12 = inlined_call_operand.vmem [shape: f32[16,10], index: 12, kind: output, shape index: {1}]   ;;  %s1776_s13 = inlined_call_operand.hbm [shape: f32[1,1], index: 13, kind: output, shape index: {2}]  }
   0x1   :  { %v42_v0 = vld [vmem:[%s1763_s0] sm:$0xff]  ;;  %v50_v1 = vld [vmem:[%s1766_s3 + $0x18] sm:$0xff]  ;;  %v49_v2 = vld [vmem:[%s1766_s3 + $0x10] sm:$0xff] }
   0x2   :  { %54 = vrot.lane.b32.xlu0 %v42_v0, %s1304_s29  ;;  %75 = vmatpush.msra.mxu0 %v50_v1  ;;  %v48_v3 = vld [vmem:[%s1766_s3 + $0x8] sm:$0xff] }
   0x3   :  { %1174 = vmatpush.msra.mxu1 %v50_v1 }
   0x4   :  { %19 = vsyncpa [#allocation3], 0  ;;  %76 = vmatpush.msra.mxu0 %v49_v2  ;;  %v47_v4 = vld [vmem:[%s1766_s3] sm:$0xff]  ;;  %v43_v5 = vld [vmem:[%s1763_s0 + $0x8] sm:$0xff]  ;;  %vm58_vm0 = vcmask 261120   ;;  %v1305_v17 = vmov 0  }
   0x5   :  { %1175 = vmatpush.msra.mxu1 %v49_v2  ;;  %v129_v8 = vld [vmem:[%s1767_s4 + $0x18] sm:$0xff]  ;;  %v1412_v9 = vld [vmem:[%s1773_s10] sm:$0x1f]  ;;  %v128_v10 = vld [vmem:[%s1767_s4 + $0x10] sm:$0xff]  ;;  %1189 = vset.pattern.permute.xlu1 %v1305_v17  ;;  %v1306_v27 = vmov 0.0   ;;  %vm178_vm9 = vcmask 326656  }
   0x6   :  { %77 = vmatpush.msra.mxu0 %v48_v3  ;;  %v51_v11 = vperm.slane %v1412_v9, 0  ;;  %v127_v12 = vld [vmem:[%s1767_s4 + $0x8] sm:$0xff]  ;;  %v126_v13 = vld [vmem:[%s1767_s4] sm:$0xff]  ;;  %v175_v53 = vld [vmem:[%s1768_s5 + $0x18] sm:$0xff]  ;;  %v130_v59 = vperm.slane %v1412_v9, 1  ;;  %s1308_s28 = smov 112  }
   0x7   :  { %1176 = vmatpush.msra.mxu1 %v48_v3  ;;  %v1427_v18 = vld [vmem:[%s1764_s1] sm:$0xff]  ;;  %v1433_v21 = vld [vmem:[%s1769_s6 + $0x8] sm:$0xff]  ;;  %v174_v54 = vld [vmem:[%s1768_s5 + $0x10] sm:$0xff]  ;;  %vm210_vm14 = vcmask 130048   ;;  %s1312_s24 = smov 24   ;;  %s1313_s16 = smov [#allocation2]  }
   0x8   :  { %78 = vmatpush.msra.mxu0 %v47_v4  ;;  %162 = vperm.xlu1 %1189, %v1427_v18   ;;  %v1438_v22 = vld [vmem:[%s1769_s6] sm:$0xff]  ;;  %v1445_v25 = vld [vmem:[%s1764_s1 + $0x8] sm:$0xff] }
   0x9   :  { %1177 = vmatpush.msra.mxu1 %v47_v4  ;;  %228 = vmatpush.msra.mxu3 %v1433_v21  ;;  %v176_v52 = vld [vmem:[%s1768_s5 + $0x20] sm:$0xff]  ;;  %v173_v55 = vld [vmem:[%s1768_s5 + $0x8] sm:$0xff]  ;;  %v177_v4 = vperm.slane %v1412_v9, 2 }
   0xa   :  { %56 = vrot.lane.b32.xlu0 %v43_v5, %s1304_s29  ;;  %433 = vmatpush.msrb.mxu0 %v1433_v21  ;;  %v172_v56 = vld [vmem:[%s1768_s5] sm:$0xff]  ;;  %s1307_s5 = smov 32  }
   0xb   :  { %149 = vmatpush.msrb.mxu1 %v129_v8  ;;  %229 = vmatpush.msra.mxu3 %v1438_v22 }
   0xc   :  { %434 = vmatpush.msrb.mxu0 %v1438_v22  ;;  %230 = vmatmul.f32.vlgmr.msra.gmra.mxu3 %v1306_v27 }
   0xd   :  { %150 = vmatpush.msrb.mxu1 %v128_v10  ;;  %295 = vmatpush.msrb.mxu3 %v1433_v21 }
   0xe   :  { %196 = vmatpush.msra.mxu2 %v176_v52 }
   0xf   :  { %151 = vmatpush.msrb.mxu1 %v127_v12  ;;  %296 = vmatpush.msrb.mxu3 %v1438_v22 }
  0x10   :  { %167 = vperm.xlu1 %1189, %v1445_v25   ;;  %197 = vmatpush.msra.mxu2 %v175_v53 }
  0x11   :  { %152 = vmatpush.msrb.mxu1 %v126_v13  ;;  %364 = vmatpush.msra.mxu3 %v1433_v21 }
  0x12   :  { %198 = vmatpush.msra.mxu2 %v174_v54 }
  0x13   :  { %365 = vmatpush.msra.mxu3 %v1438_v22 }
  0x14   :  { %199 = vmatpush.msra.mxu2 %v173_v55 }
  0x16   :  { %200 = vmatpush.msra.mxu2 %v172_v56 }
  0x18   :  { %567 = vmatpush.msrb.mxu2 %v1433_v21 }
  0x1a   :  { %568 = vmatpush.msrb.mxu2 %v1438_v22 }
  0x74   :  { %v55_v6 = vpop.permute.xlu0 %54 }
  0x75   :  { %1139 = vmatmul.msk.f32.vlgmr.msra.gmra.mxu0 %vm58_vm0, %v55_v6 }
  0x76   :  { %705 = vmatpush.msra.mxu0 %v1433_v21 }
  0x78   :  { %706 = vmatpush.msra.mxu0 %v1438_v22 }
  0x7a   :  { %v163_v60 = vpop.permute.xlu1 %162 }
  0x7c   :  { %v57_v7 = vpop.permute.xlu0 %56 }
  0x7d   :  { %1140 = vmatmul.msk.f32.vlgmr.msra.gmra.mxu1 %vm58_vm0, %v57_v7 }
  0x7e   :  { %498 = vmatpush.msra.mxu1 %v1433_v21 }
  0x80   :  { %499 = vmatpush.msra.mxu1 %v1438_v22 }
  0x82   :  { %v168_v2 = vpop.permute.xlu1 %167 }
  0x8f   :  { %v231_v57 = vpop.f32.mrf.mxu3 }
  0x90   :  { %v235_v58 = vrot.slane %v231_v57, 2 }
  0x92   :  { %257 = vrot.lane.b32.xlu2 %v235_v58, %s1304_s29 }
  0xf2   :  { %v80_v14 = vpop.f32.mrf.mxu0 }
  0xf3   :  { %v81_v15 = vadd.f32 %v80_v14, %v51_v11 }
  0xf5   :  { %v1141_v16 = vmul.f32 -1.442695, %v81_v15 }
  0xf7   :  { %1195 = vpow2.f32 %v1141_v16 }
  0xfa   :  { %v83_v19 = vpop.f32.mrf.mxu1 }
  0xfb   :  { %v84_v20 = vadd.f32 %v83_v19, %v51_v11 }
  0xfd   :  { %v1196_v23 = vpop.eup %1195  ;;  %v1142_v24 = vmul.f32 -1.442695, %v84_v20 }
  0xfe   :  { %v92_v26 = vadd.f32 1.0, %v1196_v23 }
  0xff   :  { %1197 = vpow2.f32 %v1142_v24  ;;  %v258_v24 = vpop.permute.xlu2 %257 }
 0x100   :  { %1199 = vrcp.f32 %v92_v26  ;;  %v105_v33 = vand.u32 2147483648, %v92_v26  ;;  %v103_v35 = vand.u32 2147483647, %v92_v26  ;;  %vm99_vm2 = vweird.f32 %v92_v26 }
 0x102   :  { %v106_v38 = vor.u32 1.1754944e-38, %v105_v33  ;;  %vm104_vm4 = vcmp.eq.f32.partialorder %v103_v35, 8.507059e+37 }
 0x105   :  { %v1198_v28 = vpop.eup %1197 }
 0x106   :  { %v1200_v29 = vpop.eup %1199  ;;  %v93_v30 = vadd.f32 1.0, %v1198_v28 }
 0x107   :  { %v95_v31 = vmul.f32 %v1200_v29, %v92_v26  ;;  %vm100_vm1 = vweird.f32 %v1200_v29 }
 0x108   :  { %1201 = vrcp.f32 %v93_v30  ;;  %vm101_vm3 = vmor %vm99_vm2, %vm100_vm1  ;;  %v120_v44 = vand.u32 2147483648, %v93_v30  ;;  %v118_v46 = vand.u32 2147483647, %v93_v30  ;;  %vm114_vm6 = vweird.f32 %v93_v30 }
 0x109   :  { %v96_v32 = vsub.f32 1.0, %v95_v31 }
 0x10a   :  { %v121_v48 = vor.u32 1.1754944e-38, %v120_v44  ;;  %vm119_vm8 = vcmp.eq.f32.partialorder %v118_v46, 8.507059e+37 }
 0x10b   :  { %v97_v34 = vmul.f32 %v1200_v29, %v96_v32 }
 0x10d   :  { %v98_v36 = vadd.f32 %v1200_v29, %v97_v34 }
 0x10e   :  { %v1202_v37 = vpop.eup %1201 }
 0x10f   :  { %v102_v39 = vsel %vm101_vm3, %v1200_v29, %v98_v36  ;;  %v110_v40 = vmul.f32 %v1202_v37, %v93_v30  ;;  %vm115_vm5 = vweird.f32 %v1202_v37 }
 0x110   :  { %v107_v41 = vsel %vm104_vm4, %v106_v38, %v102_v39  ;;  %vm116_vm7 = vmor %vm114_vm6, %vm115_vm5 }
 0x111   :  { %v124_v42 = vmul.f32 %v107_v41, %v81_v15  ;;  %v111_v43 = vsub.f32 1.0, %v110_v40 }
 0x113   :  { %v112_v45 = vmul.f32 %v1202_v37, %v111_v43  ;;  %1143 = vmatmul.msk.f32.vlgmr.msrb.gmra.mxu1 %vm58_vm0, %v124_v42 }
 0x115   :  { %v113_v47 = vadd.f32 %v1202_v37, %v112_v45 }
 0x117   :  { %v117_v49 = vsel %vm116_vm7, %v1202_v37, %v113_v47 }
 0x118   :  { %v122_v50 = vsel %vm119_vm8, %v121_v48, %v117_v49 }
 0x119   :  { %v125_v51 = vmul.f32 %v122_v50, %v84_v20 }
 0x11b   :  { %1144 = vmatmul.msk.f32.gmra.mxu1 %vm58_vm0, %v125_v51 }
 0x190   :  { %v154_v61 = vpop.f32.mrf.mxu1 }
 0x191   :  { %v155_v62 = vadd.f32 %v154_v61, %v130_v59 }
 0x193   :  { %v1479_v63 = vmul.f32 %v163_v60, %v155_v62 }
 0x195   :  { %1145 = vmatmul.msk.f32.vlgmr.msra.gmra.mxu2 %vm178_vm9, %v1479_v63 }
 0x198   :  { %v157_v0 = vpop.f32.mrf.mxu1 }
 0x199   :  { %v158_v1 = vadd.f32 %v157_v0, %v130_v59 }
 0x19b   :  { %v1482_v3 = vmul.f32 %v168_v2, %v158_v1 }
 0x19d   :  { %1146 = vmatmul.msk.f32.gmra.mxu2 %vm178_vm9, %v1482_v3 }
 0x218   :  { %v202_v5 = vpop.f32.mrf.mxu2 }
 0x219   :  { %v1486_v6 = vadd.f32 %v202_v5, %v177_v4 }
 0x220   :  { %v205_v7 = vpop.f32.mrf.mxu2 }
 0x221   :  { %v1488_v8 = vadd.f32 %v205_v7, %v177_v4 }
 0x223   :  { %v237_v10 = vadd.f32 %v235_v58, %v1488_v8 }
 0x225   :  { %v1147_v11 = vmul.f32 -1.442695, %v237_v10 }
 0x227   :  { %1203 = vpow2.f32 %v1147_v11 }
 0x22d   :  { %v1204_v12 = vpop.eup %1203 }
 0x22e   :  { %v241_v13 = vadd.f32 1.0, %v1204_v12 }
 0x230   :  { %1205 = vrcp.f32 %v241_v13  ;;  %v253_v17 = vand.u32 2147483648, %v241_v13  ;;  %v251_v20 = vand.u32 2147483647, %v241_v13  ;;  %vm247_vm11 = vweird.f32 %v241_v13 }
 0x232   :  { %v254_v26 = vor.u32 1.1754944e-38, %v253_v17  ;;  %vm252_vm13 = vcmp.eq.f32.partialorder %v251_v20, 8.507059e+37 }
 0x236   :  { %v1206_v14 = vpop.eup %1205 }
 0x237   :  { %v243_v15 = vmul.f32 %v1206_v14, %v241_v13  ;;  %vm248_vm10 = vweird.f32 %v1206_v14 }
 0x238   :  { %vm249_vm12 = vmor %vm247_vm11, %vm248_vm10 }
 0x239   :  { %v244_v16 = vsub.f32 1.0, %v243_v15 }
 0x23b   :  { %v245_v19 = vmul.f32 %v1206_v14, %v244_v16 }
 0x23d   :  { %v246_v23 = vadd.f32 %v1206_v14, %v245_v19 }
 0x23f   :  { %v250_v27 = vsel %vm249_vm12, %v1206_v14, %v246_v23 }
 0x240   :  { %v255_v28 = vsel %vm252_vm13, %v254_v26, %v250_v27 }
 0x241   :  { %v260_v29 = vmul.f32 %v258_v24, %v255_v28  ;;  %v267_v33 = vsub.f32 1.0, %v255_v28  ;;  %v273_v35 = vmul.f32 0.0, %v255_v28 }
 0x243   :  { %262 = vrot.lane.b32.xlu2 %v260_v29, %s1307_s5 }
 0x29d   :  { %v263_v30 = vpop.permute.xlu2 %262 }
 0x29e   :  { %v265_v31 = vadd.f32 %v263_v30, %v1488_v8 }
 0x2a0   :  { %1207 = vtanh.f32 %v265_v31 }
 0x2a6   :  { %v1208_v32 = vpop.eup %1207 }
 0x2a7   :  { %269 = vrot.lane.b32.xlu0 %v1208_v32, %s1308_s28 }
 0x319   :  { %v270_v34 = vpop.permute.xlu0 %269 }
 0x31a   :  { %v272_v36 = vmul.f32 %v270_v34, %v267_v33 }
 0x31c   :  { %v1494_v37 = vadd.f32 %v273_v35, %v272_v36 }
 0x31e   :  { %v276_v38 = vrot.slane %v1494_v37, 6  ;;  %v340_v60 = vrot.slane %v1494_v37, 2 }
 0x320   :  { %277 = vrot.lane.b32.xlu1 %v276_v38, %s1308_s28 }
 0x392   :  { %v278_v39 = vpop.permute.xlu1 %277 }
 0x393   :  { %1148 = vmatmul.msk.f32.vlgmr.msrb.gmra.mxu3 %vm210_vm14, %v278_v39 }
 0x394   :  { %636 = vmatpush.msrb.mxu3 %v1433_v21 }
 0x396   :  { %637 = vmatpush.msrb.mxu3 %v1438_v22 }
 0x416   :  { %v298_v40 = vpop.f32.mrf.mxu3 }
 0x417   :  { %v302_v41 = vrot.slane %v298_v40, 4 }
 0x419   :  { %324 = vrot.lane.b32.xlu2 %v302_v41, %s1304_s29  ;;  %v304_v42 = vadd.f32 %v302_v41, %v1488_v8 }
 0x41b   :  { %v1149_v43 = vmul.f32 -1.442695, %v304_v42 }
 0x41d   :  { %1209 = vpow2.f32 %v1149_v43 }
 0x423   :  { %v1210_v44 = vpop.eup %1209 }
 0x424   :  { %v308_v45 = vadd.f32 1.0, %v1210_v44 }
 0x426   :  { %1211 = vrcp.f32 %v308_v45  ;;  %v320_v21 = vand.u32 2147483648, %v308_v45  ;;  %vm314_vm1 = vweird.f32 %v308_v45  ;;  %v318_v22 = vand.u32 2147483647, %v308_v45 }
 0x428   :  { %v321_v52 = vor.u32 1.1754944e-38, %v320_v21  ;;  %vm319_vm3 = vcmp.eq.f32.partialorder %v318_v22, 8.507059e+37 }
 0x42c   :  { %v1212_v46 = vpop.eup %1211 }
 0x42d   :  { %v310_v47 = vmul.f32 %v1212_v46, %v308_v45  ;;  %vm315_vm15 = vweird.f32 %v1212_v46 }
 0x42e   :  { %vm316_vm2 = vmor %vm314_vm1, %vm315_vm15 }
 0x42f   :  { %v311_v48 = vsub.f32 1.0, %v310_v47 }
 0x431   :  { %v312_v49 = vmul.f32 %v1212_v46, %v311_v48 }
 0x433   :  { %v313_v50 = vadd.f32 %v1212_v46, %v312_v49 }
 0x435   :  { %v317_v51 = vsel %vm316_vm2, %v1212_v46, %v313_v50 }
 0x436   :  { %v322_v54 = vsel %vm319_vm3, %v321_v52, %v317_v51 }
 0x437   :  { %v334_v59 = vsub.f32 1.0, %v322_v54  ;;  %v342_v62 = vmul.f32 %v340_v60, %v322_v54 }
 0x473   :  { %v325_v53 = vpop.permute.xlu2 %324 }
 0x474   :  { %v327_v55 = vmul.f32 %v325_v53, %v322_v54 }
 0x476   :  { %329 = vrot.lane.b32.xlu0 %v327_v55, %s1307_s5 }
 0x4e8   :  { %v330_v56 = vpop.permute.xlu0 %329 }
 0x4e9   :  { %v332_v57 = vadd.f32 %v330_v56, %v1488_v8 }
 0x4eb   :  { %1213 = vtanh.f32 %v332_v57 }
 0x4f1   :  { %v1214_v58 = vpop.eup %1213 }
 0x4f2   :  { %336 = vrot.lane.b32.xlu1 %v1214_v58, %s1308_s28 }
 0x564   :  { %v337_v61 = vpop.permute.xlu1 %336 }
 0x565   :  { %v339_v0 = vmul.f32 %v337_v61, %v334_v59 }
 0x567   :  { %v1507_v1 = vadd.f32 %v342_v62, %v339_v0 }
 0x569   :  { %v345_v2 = vrot.slane %v1507_v1, 4  ;;  %v409_v34 = vrot.slane %v1507_v1, 2 }
 0x56b   :  { %346 = vrot.lane.b32.xlu2 %v345_v2, %s1308_s28 }
 0x5c5   :  { %v347_v4 = vpop.permute.xlu2 %346 }
 0x5c6   :  { %1150 = vmatmul.msk.f32.vlgmr.msra.gmra.mxu3 %vm210_vm14, %v347_v4 }
 0x649   :  { %v367_v5 = vpop.f32.mrf.mxu3 }
 0x64a   :  { %v371_v7 = vrot.slane %v367_v5, 6 }
 0x64c   :  { %393 = vrot.lane.b32.xlu0 %v371_v7, %s1304_s29  ;;  %v373_v10 = vadd.f32 %v371_v7, %v1488_v8 }
 0x64e   :  { %v1151_v11 = vmul.f32 -1.442695, %v373_v10 }
 0x650   :  { %1215 = vpow2.f32 %v1151_v11 }
 0x656   :  { %v1216_v12 = vpop.eup %1215 }
 0x657   :  { %v377_v13 = vadd.f32 1.0, %v1216_v12 }
 0x659   :  { %1217 = vrcp.f32 %v377_v13  ;;  %v389_v20 = vand.u32 2147483648, %v377_v13  ;;  %vm383_vm5 = vweird.f32 %v377_v13  ;;  %v387_v23 = vand.u32 2147483647, %v377_v13 }
 0x65b   :  { %v390_v26 = vor.u32 1.1754944e-38, %v389_v20  ;;  %vm388_vm7 = vcmp.eq.f32.partialorder %v387_v23, 8.507059e+37 }
 0x65f   :  { %v1218_v14 = vpop.eup %1217 }
 0x660   :  { %v379_v15 = vmul.f32 %v1218_v14, %v377_v13  ;;  %vm384_vm4 = vweird.f32 %v1218_v14 }
 0x661   :  { %vm385_vm6 = vmor %vm383_vm5, %vm384_vm4 }
 0x662   :  { %v380_v16 = vsub.f32 1.0, %v379_v15 }
 0x664   :  { %v381_v17 = vmul.f32 %v1218_v14, %v380_v16 }
 0x666   :  { %v382_v19 = vadd.f32 %v1218_v14, %v381_v17 }
 0x668   :  { %v386_v24 = vsel %vm385_vm6, %v1218_v14, %v382_v19 }
 0x669   :  { %v391_v28 = vsel %vm388_vm7, %v390_v26, %v386_v24 }
 0x66a   :  { %v403_v33 = vsub.f32 1.0, %v391_v28  ;;  %v411_v36 = vmul.f32 %v409_v34, %v391_v28 }
 0x6be   :  { %v394_v27 = vpop.permute.xlu0 %393 }
 0x6bf   :  { %v396_v29 = vmul.f32 %v394_v27, %v391_v28 }
 0x6c1   :  { %398 = vrot.lane.b32.xlu1 %v396_v29, %s1307_s5 }
 0x733   :  { %v399_v30 = vpop.permute.xlu1 %398 }
 0x734   :  { %v401_v31 = vadd.f32 %v399_v30, %v1488_v8 }
 0x736   :  { %1219 = vtanh.f32 %v401_v31 }
 0x73c   :  { %v1220_v32 = vpop.eup %1219 }
 0x73d   :  { %405 = vrot.lane.b32.xlu2 %v1220_v32, %s1308_s28 }
 0x797   :  { %v406_v35 = vpop.permute.xlu2 %405 }
 0x798   :  { %v408_v38 = vmul.f32 %v406_v35, %v403_v33 }
 0x79a   :  { %v1518_v39 = vadd.f32 %v411_v36, %v408_v38 }
 0x79c   :  { %v414_v40 = vrot.slane %v1518_v39, 2 }
 0x79e   :  { %415 = vrot.lane.b32.xlu0 %v414_v40, %s1308_s28 }
 0x810   :  { %v416_v41 = vpop.permute.xlu0 %415 }
 0x811   :  { %1152 = vmatmul.msk.f32.vlgmr.msrb.gmra.mxu0 %vm210_vm14, %v416_v41 }
 0x88e   :  { %v436_v42 = vpop.f32.mrf.mxu0 }
 0x88f   :  { %460 = vrot.lane.b32.xlu1 %v436_v42, %s1304_s29  ;;  %v439_v43 = vadd.f32 %v436_v42, %v1488_v8 }
 0x891   :  { %v1153_v44 = vmul.f32 -1.442695, %v439_v43 }
 0x893   :  { %1221 = vpow2.f32 %v1153_v44 }
 0x899   :  { %v1222_v45 = vpop.eup %1221 }
 0x89a   :  { %v443_v46 = vadd.f32 1.0, %v1222_v45 }
 0x89c   :  { %1223 = vrcp.f32 %v443_v46  ;;  %v455_v22 = vand.u32 2147483648, %v443_v46  ;;  %vm449_vm9 = vweird.f32 %v443_v46  ;;  %v453_v51 = vand.u32 2147483647, %v443_v46 }
 0x89e   :  { %v456_v53 = vor.u32 1.1754944e-38, %v455_v22  ;;  %vm454_vm11 = vcmp.eq.f32.partialorder %v453_v51, 8.507059e+37 }
 0x8a2   :  { %v1224_v47 = vpop.eup %1223 }
 0x8a3   :  { %v445_v48 = vmul.f32 %v1224_v47, %v443_v46  ;;  %vm450_vm8 = vweird.f32 %v1224_v47 }
 0x8a4   :  { %vm451_vm10 = vmor %vm449_vm9, %vm450_vm8 }
 0x8a5   :  { %v446_v49 = vsub.f32 1.0, %v445_v48 }
 0x8a7   :  { %v447_v50 = vmul.f32 %v1224_v47, %v446_v49 }
 0x8a9   :  { %v448_v21 = vadd.f32 %v1224_v47, %v447_v50 }
 0x8ab   :  { %v452_v52 = vsel %vm451_vm10, %v1224_v47, %v448_v21 }
 0x8ac   :  { %v457_v55 = vsel %vm454_vm11, %v456_v53, %v452_v52 }
 0x8ad   :  { %v470_v60 = vsub.f32 1.0, %v457_v55  ;;  %v477_v62 = vmul.f32 %v457_v55, %v414_v40 }
 0x901   :  { %v461_v54 = vpop.permute.xlu1 %460 }
 0x902   :  { %v463_v56 = vmul.f32 %v461_v54, %v457_v55 }
 0x904   :  { %465 = vrot.lane.b32.xlu2 %v463_v56, %s1307_s5 }
 0x95e   :  { %v466_v57 = vpop.permute.xlu2 %465 }
 0x95f   :  { %v468_v58 = vadd.f32 %v466_v57, %v1488_v8 }
 0x961   :  { %1225 = vtanh.f32 %v468_v58 }
 0x967   :  { %v1226_v59 = vpop.eup %1225 }
 0x968   :  { %472 = vrot.lane.b32.xlu0 %v1226_v59, %s1308_s28 }
 0x9da   :  { %v473_v61 = vpop.permute.xlu0 %472 }
 0x9db   :  { %v475_v0 = vmul.f32 %v473_v61, %v470_v60 }
 0x9dd   :  { %v1528_v2 = vadd.f32 %v477_v62, %v475_v0 }
 0x9df   :  { %480 = vrot.lane.b32.xlu1 %v1528_v2, %s1308_s28  ;;  %v543_v26 = vrot.slane %v1528_v2, 2 }
 0xa51   :  { %v481_v4 = vpop.permute.xlu1 %480 }
 0xa52   :  { %1154 = vmatmul.msk.f32.vlgmr.msra.gmra.mxu1 %vm210_vm14, %v481_v4 }
 0xacf   :  { %v501_v5 = vpop.f32.mrf.mxu1 }
 0xad0   :  { %v505_v7 = vrot.slane %v501_v5, 2 }
 0xad2   :  { %v507_v8 = vadd.f32 %v505_v7, %v1486_v6  ;;  %527 = vrot.lane.b32.xlu2 %v505_v7, %s1304_s29 }
 0xad4   :  { %v1155_v10 = vmul.f32 -1.442695, %v507_v8 }
 0xad6   :  { %1227 = vpow2.f32 %v1155_v10 }
 0xadc   :  { %v1228_v11 = vpop.eup %1227 }
 0xadd   :  { %v511_v12 = vadd.f32 1.0, %v1228_v11 }
 0xadf   :  { %1229 = vrcp.f32 %v511_v12  ;;  %v523_v16 = vand.u32 2147483648, %v511_v12  ;;  %v521_v19 = vand.u32 2147483647, %v511_v12  ;;  %vm517_vm13 = vweird.f32 %v511_v12 }
 0xae1   :  { %v524_v23 = vor.u32 1.1754944e-38, %v523_v16  ;;  %vm522_vm1 = vcmp.eq.f32.partialorder %v521_v19, 8.507059e+37 }
 0xae5   :  { %v1230_v13 = vpop.eup %1229 }
 0xae6   :  { %v513_v14 = vmul.f32 %v1230_v13, %v511_v12  ;;  %vm518_vm12 = vweird.f32 %v1230_v13 }
 0xae7   :  { %vm519_vm15 = vmor %vm517_vm13, %vm518_vm12 }
 0xae8   :  { %v514_v15 = vsub.f32 1.0, %v513_v14 }
 0xaea   :  { %v515_v17 = vmul.f32 %v1230_v13, %v514_v15 }
 0xaec   :  { %v516_v20 = vadd.f32 %v1230_v13, %v515_v17 }
 0xaee   :  { %v520_v24 = vsel %vm519_vm15, %v1230_v13, %v516_v20  ;;  %vm751_vm15 = vcmask 1041408  }
 0xaef   :  { %v525_v27 = vsel %vm522_vm1, %v524_v23, %v520_v24  ;;  %vm753_vm1 = vcmask 1043456  }
 0xaf0   :  { %v545_v28 = vmul.f32 %v543_v26, %v525_v27  ;;  %v537_v34 = vsub.f32 1.0, %v525_v27 }
 0xb2c   :  { %v528_v29 = vpop.permute.xlu2 %527 }
 0xb2d   :  { %v530_v30 = vmul.f32 %v528_v29, %v525_v27 }
 0xb2f   :  { %532 = vrot.lane.b32.xlu0 %v530_v30, %s1307_s5 }
 0xba1   :  { %v533_v31 = vpop.permute.xlu0 %532 }
 0xba2   :  { %v535_v32 = vadd.f32 %v533_v31, %v1486_v6 }
 0xba4   :  { %1231 = vtanh.f32 %v535_v32 }
 0xbaa   :  { %v1232_v33 = vpop.eup %1231 }
 0xbab   :  { %539 = vrot.lane.b32.xlu1 %v1232_v33, %s1308_s28 }
 0xc1d   :  { %v540_v35 = vpop.permute.xlu1 %539 }
 0xc1e   :  { %v542_v36 = vmul.f32 %v540_v35, %v537_v34 }
 0xc20   :  { %v1539_v38 = vadd.f32 %v545_v28, %v542_v36 }
 0xc22   :  { %v548_v40 = vrot.slane %v1539_v38, 6  ;;  %v612_v62 = vrot.slane %v1539_v38, 2 }
 0xc24   :  { %549 = vrot.lane.b32.xlu2 %v548_v40, %s1308_s28 }
 0xc7e   :  { %v550_v41 = vpop.permute.xlu2 %549 }
 0xc7f   :  { %1156 = vmatmul.msk.f32.vlgmr.msrb.gmra.mxu2 %vm210_vm14, %v550_v41 }
 0xd02   :  { %v570_v42 = vpop.f32.mrf.mxu2 }
 0xd03   :  { %v574_v43 = vrot.slane %v570_v42, 4 }
 0xd05   :  { %596 = vrot.lane.b32.xlu0 %v574_v43, %s1304_s29  ;;  %v576_v44 = vadd.f32 %v574_v43, %v1486_v6 }
 0xd07   :  { %v1157_v45 = vmul.f32 -1.442695, %v576_v44 }
 0xd09   :  { %1233 = vpow2.f32 %v1157_v45 }
 0xd0f   :  { %v1234_v46 = vpop.eup %1233 }
 0xd10   :  { %v580_v47 = vadd.f32 1.0, %v1234_v46 }
 0xd12   :  { %1235 = vrcp.f32 %v580_v47  ;;  %v592_v51 = vand.u32 2147483648, %v580_v47  ;;  %vm586_vm3 = vweird.f32 %v580_v47  ;;  %v590_v52 = vand.u32 2147483647, %v580_v47 }
 0xd14   :  { %v593_v54 = vor.u32 1.1754944e-38, %v592_v51  ;;  %vm591_vm5 = vcmp.eq.f32.partialorder %v590_v52, 8.507059e+37 }
 0xd18   :  { %v1236_v48 = vpop.eup %1235 }
 0xd19   :  { %v582_v49 = vmul.f32 %v1236_v48, %v580_v47  ;;  %vm587_vm2 = vweird.f32 %v1236_v48 }
 0xd1a   :  { %vm588_vm4 = vmor %vm586_vm3, %vm587_vm2  ;;  %vm755_vm2 = vcmask 1045504  }
 0xd1b   :  { %v583_v50 = vsub.f32 1.0, %v582_v49 }
 0xd1d   :  { %v584_v21 = vmul.f32 %v1236_v48, %v583_v50 }
 0xd1f   :  { %v585_v22 = vadd.f32 %v1236_v48, %v584_v21 }
 0xd21   :  { %v589_v53 = vsel %vm588_vm4, %v1236_v48, %v585_v22 }
 0xd22   :  { %v594_v56 = vsel %vm591_vm5, %v593_v54, %v589_v53 }
 0xd23   :  { %v606_v61 = vsub.f32 1.0, %v594_v56  ;;  %v614_v4 = vmul.f32 %v612_v62, %v594_v56  ;;  %v757_v62 = vsel %vm751_vm15, %v1528_v2, %v1518_v39  ;;  %v1310_v39 = vmov 1  }
 0xd24   :  { %1191 = vset.pattern.permute.xlu2 %v1310_v39  ;;  %1190 = vset.pattern.permute.xlu1 %v1310_v39 }
 0xd77   :  { %v597_v55 = vpop.permute.xlu0 %596 }
 0xd78   :  { %v599_v57 = vmul.f32 %v597_v55, %v594_v56 }
 0xd7a   :  { %601 = vrot.lane.b32.xlu1 %v599_v57, %s1307_s5 }
 0xdec   :  { %v602_v58 = vpop.permute.xlu1 %601 }
 0xded   :  { %v604_v59 = vadd.f32 %v602_v58, %v1486_v6 }
 0xdef   :  { %1237 = vtanh.f32 %v604_v59 }
 0xdf5   :  { %v1238_v60 = vpop.eup %1237 }
 0xdf6   :  { %608 = vrot.lane.b32.xlu2 %v1238_v60, %s1308_s28 }
 0xe50   :  { %v609_v0 = vpop.permute.xlu2 %608 }
 0xe51   :  { %v611_v5 = vmul.f32 %v609_v0, %v606_v61  ;;  %v758_v0 = vsel %vm753_vm1, %v757_v62, %v1507_v1  ;;  %v760_v1 = vld [vmem:[%s1770_s7] sm:$0xff] }
 0xe53   :  { %v1550_v7 = vadd.f32 %v614_v4, %v611_v5  ;;  %v759_v4 = vsel %vm755_vm2, %v758_v0, %v1494_v37  ;;  %v761_v37 = vld [vmem:[%s1770_s7 + $0x8] sm:$0xff]  ;;  %s1124_s7 = sshll.u32 %s1313_s16, 4  ;;  %s1125_s7 = int_to_ptr.vmem [resolvable:$true] %s1124_s7 }
 0xe54   :  { %787 = vmatpush.msrb.mxu1 %v761_v37 }
 0xe55   :  { %v617_v8 = vrot.slane %v1550_v7, 4  ;;  %v681_v40 = vrot.slane %v1550_v7, 2 }
 0xe56   :  { %788 = vmatpush.msrb.mxu1 %v760_v1 }
 0xe57   :  { %618 = vrot.lane.b32.xlu0 %v617_v8, %s1308_s28 }
 0xec9   :  { %v619_v10 = vpop.permute.xlu0 %618 }
 0xeca   :  { %1158 = vmatmul.msk.f32.vlgmr.msrb.gmra.mxu3 %vm210_vm14, %v619_v10 }
 0xf4d   :  { %v639_v11 = vpop.f32.mrf.mxu3 }
 0xf4e   :  { %v643_v12 = vrot.slane %v639_v11, 6 }
 0xf50   :  { %665 = vrot.lane.b32.xlu1 %v643_v12, %s1304_s29  ;;  %v645_v13 = vadd.f32 %v643_v12, %v1486_v6 }
 0xf52   :  { %v1159_v14 = vmul.f32 -1.442695, %v645_v13 }
 0xf54   :  { %1239 = vpow2.f32 %v1159_v14 }
 0xf5a   :  { %v1240_v15 = vpop.eup %1239 }
 0xf5b   :  { %v649_v16 = vadd.f32 1.0, %v1240_v15 }
 0xf5d   :  { %1241 = vrcp.f32 %v649_v16  ;;  %v661_v26 = vand.u32 2147483648, %v649_v16  ;;  %vm655_vm7 = vweird.f32 %v649_v16  ;;  %v659_v27 = vand.u32 2147483647, %v649_v16 }
 0xf5f   :  { %v662_v29 = vor.u32 1.1754944e-38, %v661_v26  ;;  %vm660_vm9 = vcmp.eq.f32.partialorder %v659_v27, 8.507059e+37  ;;  %v838_v26 = vld [vmem:[%s1772_s9 + $0x10] sm:$0xff]  ;;  %v762_v27 = vperm.slane %v1412_v9, 3  ;;  %v837_v9 = vld [vmem:[%s1772_s9 + $0x8] sm:$0xff] }
 0xf63   :  { %v1242_v17 = vpop.eup %1241 }
 0xf64   :  { %v651_v19 = vmul.f32 %v1242_v17, %v649_v16  ;;  %vm656_vm6 = vweird.f32 %v1242_v17 }
 0xf65   :  { %vm657_vm8 = vmor %vm655_vm7, %vm656_vm6 }
 0xf66   :  { %v652_v20 = vsub.f32 1.0, %v651_v19 }
 0xf68   :  { %v653_v23 = vmul.f32 %v1242_v17, %v652_v20 }
 0xf6a   :  { %v654_v24 = vadd.f32 %v1242_v17, %v653_v23  ;;  %v840_v23 = vld [vmem:[%s1772_s9 + $0x20] sm:$0xff] }
 0xf6c   :  { %v658_v28 = vsel %vm657_vm8, %v1242_v17, %v654_v24  ;;  %v1311_v17 = vmov 2   ;;  %v839_v24 = vld [vmem:[%s1772_s9 + $0x18] sm:$0xff] }
 0xf6d   :  { %v663_v31 = vsel %vm660_vm9, %v662_v29, %v658_v28  ;;  %1194 = vset.pattern.permute.xlu0 %v1311_v17 }
 0xf6e   :  { %v675_v36 = vsub.f32 1.0, %v663_v31  ;;  %v683_v42 = vmul.f32 %v681_v40, %v663_v31 }
 0xfc2   :  { %v666_v30 = vpop.permute.xlu1 %665 }
 0xfc3   :  { %v668_v32 = vmul.f32 %v666_v30, %v663_v31 }
 0xfc5   :  { %670 = vrot.lane.b32.xlu2 %v668_v32, %s1307_s5 }
0x101f   :  { %v671_v33 = vpop.permute.xlu2 %670 }
0x1020   :  { %v673_v34 = vadd.f32 %v671_v33, %v1486_v6 }
0x1022   :  { %1243 = vtanh.f32 %v673_v34 }
0x1028   :  { %v1244_v35 = vpop.eup %1243 }
0x1029   :  { %677 = vrot.lane.b32.xlu0 %v1244_v35, %s1308_s28 }
0x109b   :  { %v678_v41 = vpop.permute.xlu0 %677 }
0x109c   :  { %v680_v43 = vmul.f32 %v678_v41, %v675_v36  ;;  %v836_v36 = vld [vmem:[%s1772_s9] sm:$0xff] }
0x109e   :  { %v684_v44 = vadd.f32 %v683_v42, %v680_v43 }
0x10a0   :  { %v686_v45 = vrot.slane %v684_v44, 2 }
0x10a2   :  { %687 = vrot.lane.b32.xlu1 %v686_v45, %s1308_s28 }
0x1114   :  { %v688_v46 = vpop.permute.xlu1 %687 }
0x1115   :  { %1160 = vmatmul.msk.f32.vlgmr.msra.gmra.mxu0 %vm210_vm14, %v688_v46 }
0x1192   :  { %v708_v47 = vpop.f32.mrf.mxu0 }
0x1193   :  { %732 = vrot.lane.b32.xlu2 %v708_v47, %s1304_s29  ;;  %v711_v48 = vadd.f32 %v708_v47, %v1486_v6  ;;  %s1309_s29 = smov 120   ;;  %v1632_v47 = vld [vmem:[%s1771_s8] sm:$0xff] }
0x1194   :  { %1014 = vmatpush.msrb.mxu0 %v1632_v47  ;;  %1178 = vmatpush.msra.mxu3 %v1632_v47 }
0x1195   :  { %v1161_v49 = vmul.f32 -1.442695, %v711_v48 }
0x1197   :  { %1245 = vpow2.f32 %v1161_v49 }
0x119d   :  { %v1246_v50 = vpop.eup %1245 }
0x119e   :  { %v715_v21 = vadd.f32 1.0, %v1246_v50 }
0x11a0   :  { %1247 = vrcp.f32 %v715_v21  ;;  %v727_v55 = vand.u32 2147483648, %v715_v21  ;;  %vm721_vm11 = vweird.f32 %v715_v21  ;;  %v725_v56 = vand.u32 2147483647, %v715_v21 }
0x11a2   :  { %v728_v58 = vor.u32 1.1754944e-38, %v727_v55  ;;  %vm726_vm13 = vcmp.eq.f32.partialorder %v725_v56, 8.507059e+37 }
0x11a6   :  { %v1248_v22 = vpop.eup %1247 }
0x11a7   :  { %v717_v51 = vmul.f32 %v1248_v22, %v715_v21  ;;  %vm722_vm10 = vweird.f32 %v1248_v22 }
0x11a8   :  { %vm723_vm12 = vmor %vm721_vm11, %vm722_vm10 }
0x11a9   :  { %v718_v52 = vsub.f32 1.0, %v717_v51 }
0x11ab   :  { %v719_v53 = vmul.f32 %v1248_v22, %v718_v52 }
0x11ad   :  { %v720_v54 = vadd.f32 %v1248_v22, %v719_v53 }
0x11af   :  { %v724_v57 = vsel %vm723_vm12, %v1248_v22, %v720_v54 }
0x11b0   :  { %v729_v60 = vsel %vm726_vm13, %v728_v58, %v724_v57  ;;  %vm946_vm13 = vcmask 64512  }
0x11b1   :  { %v749_v11 = vmul.f32 %v729_v60, %v686_v45 }
0x11ed   :  { %v733_v59 = vpop.permute.xlu2 %732 }
0x11ee   :  { %v735_v61 = vmul.f32 %v733_v59, %v729_v60 }
0x11f0   :  { %737 = vrot.lane.b32.xlu0 %v735_v61, %s1307_s5 }
0x11f8   :  { %767 = vrot.lane.b32.xlu0 %v759_v4, %s1308_s28 }
0x1200   :  { %818 = vrot.lane.b32.xlu0 %v1479_v63, %s1309_s29 }
0x1262   :  { %v738_v5 = vpop.permute.xlu0 %737 }
0x1263   :  { %v740_v8 = vadd.f32 %v738_v5, %v1486_v6  ;;  %v742_v6 = vsub.f32 1.0, %v729_v60 }
0x1265   :  { %1249 = vtanh.f32 %v740_v8 }
0x126a   :  { %v768_v20 = vpop.permute.xlu0 %767 }
0x126b   :  { %v1250_v10 = vpop.eup %1249 }
0x126c   :  { %744 = vrot.lane.b32.xlu1 %v1250_v10, %s1308_s28 }
0x1272   :  { %v819_v40 = vpop.permute.xlu0 %818 }
0x1274   :  { %797 = vperm.xlu1 %1190, %v1427_v18  }
0x127c   :  { %1192 = vset.pattern.permute.xlu1 %v1311_v17 }
0x12de   :  { %v745_v2 = vpop.permute.xlu1 %744 }
0x12df   :  { %v747_v12 = vmul.f32 %v745_v2, %v742_v6 }
0x12e1   :  { %v750_v13 = vadd.f32 %v749_v11, %v747_v12 }
0x12e3   :  { %v752_v14 = vsel %vm751_vm15, %v750_v13, %v684_v44 }
0x12e4   :  { %v754_v15 = vsel %vm753_vm1, %v752_v14, %v1550_v7  ;;  %v842_v7 = vld [vmem:[%s1772_s9 + $0x30] sm:$0xff] }
0x12e5   :  { %v756_v16 = vsel %vm755_vm2, %v754_v15, %v1539_v38  ;;  %v843_v38 = vld [vmem:[%s1772_s9 + $0x38] sm:$0xff]  ;;  %vm1084_vm2 = vcmask 72704  }
0x12e6   :  { %765 = vrot.lane.b32.xlu2 %v756_v16, %s1308_s28  ;;  %859 = vmatpush.msra.mxu2 %v843_v38  ;;  %v798_v29 = vpop.permute.xlu1 %797 }
0x12e8   :  { %860 = vmatpush.msra.mxu2 %v842_v7 }
0x12ee   :  { %801 = vperm.xlu2 %1191, %v1445_v25  }
0x12f6   :  { %820 = vrot.lane.b32.xlu2 %v1482_v3, %s1309_s29 }
0x12f7   :  { %1193 = vset.pattern.permute.xlu2 %v1311_v17 }
0x12fe   :  { %809 = vperm.xlu2 %1193, %v1427_v18   ;;  %v841_v18 = vld [vmem:[%s1772_s9 + $0x28] sm:$0xff] }
0x12ff   :  { %861 = vmatpush.msra.mxu2 %v841_v18 }
0x1301   :  { %862 = vmatpush.msra.mxu2 %v840_v23 }
0x1303   :  { %863 = vmatpush.msra.mxu2 %v839_v24 }
0x1305   :  { %864 = vmatpush.msra.mxu2 %v838_v26  ;;  %v955_v26 = vld [vmem:[%s1765_s2] sm:$0xff] }
0x1307   :  { %865 = vmatpush.msra.mxu2 %v837_v9 }
0x1309   :  { %866 = vmatpush.msra.mxu2 %v836_v36 }
0x1340   :  { %v766_v19 = vpop.permute.xlu2 %765 }
0x1341   :  { %1162 = vmatmul.msk.f32.vlgmr.msrb.gmra.mxu1 %vm210_vm14, %v766_v19 }
0x1348   :  { %v802_v34 = vpop.permute.xlu2 %801 }
0x1349   :  { %1163 = vmatmul.msk.f32.gmra.mxu1 %vm210_vm14, %v768_v20  ;;  %vm844_vm14 = vcmask 523264  }
0x13be   :  { %v790_v28 = vpop.f32.mrf.mxu1 }
0x13bf   :  { %v791_v30 = vadd.f32 %v790_v28, %v762_v27 }
0x13c1   :  { %v1614_v31 = vmul.f32 %v798_v29, %v791_v30 }
0x13c3   :  { %826 = vrot.lane.b32.xlu1 %v1614_v31, %s1312_s24  ;;  %v806_v19 = vadd.f32 %v1614_v31, %v1479_v63  ;;  %v959_v63 = vld [vmem:[%s1765_s2 + $0x20] sm:$0xff] }
0x13c6   :  { %v793_v32 = vpop.f32.mrf.mxu1 }
0x13c7   :  { %v794_v33 = vadd.f32 %v793_v32, %v762_v27  ;;  %v957_v27 = vld [vmem:[%s1765_s2 + $0x10] sm:$0xff] }
0x13c9   :  { %v1617_v35 = vmul.f32 %v802_v34, %v794_v33 }
0x13cb   :  { %813 = vperm.xlu1 %1192, %v1445_v25   ;;  %828 = vrot.lane.b32.xlu0 %v1617_v35, %s1312_s24  ;;  %v821_v25 = vpop.permute.xlu2 %820 }
0x13d3   :  { %v810_v48 = vpop.permute.xlu2 %809 }
0x13d4   :  { %v816_v23 = vmul.f32 %v810_v48, %v806_v19 }
0x1435   :  { %v827_v41 = vpop.permute.xlu1 %826 }
0x1436   :  { %v832_v42 = vsel %vm58_vm0, %v819_v40, %v827_v41 }
0x1437   :  { %v834_v43 = vmul.f32 %v832_v42, %v832_v42 }
0x1439   :  { %1164 = vmatmul.msk.f32.vlgmr.msra.gmra.mxu2 %vm844_vm14, %v834_v43  ;;  %v807_v43 = vadd.f32 %v1617_v35, %v1482_v3  ;;  %v958_v3 = vld [vmem:[%s1765_s2 + $0x18] sm:$0xff]  ;;  %v960_v35 = vld [vmem:[%s1765_s2 + $0x28] sm:$0xff] }
0x143d   :  { %v829_v44 = vpop.permute.xlu0 %828  ;;  %v1636_v22 = vpop.permute.xlu1 %813 }
0x143e   :  { %v833_v45 = vsel %vm58_vm0, %v821_v25, %v829_v44 }
0x143f   :  { %v835_v46 = vmul.f32 %v833_v45, %v833_v45  ;;  %v956_v45 = vld [vmem:[%s1765_s2 + $0x8] sm:$0xff] }
0x1441   :  { %1165 = vmatmul.msk.f32.gmra.mxu2 %vm844_vm14, %v835_v46  ;;  %v817_v46 = vmul.f32 %v1636_v22, %v807_v43  ;;  %vm1087_vm14 = vcmask 80896  }
0x14bc   :  { %v868_v49 = vpop.f32.mrf.mxu2 }
0x14bd   :  { %v874_v50 = vmul.f32 %v868_v49, %v810_v48 }
0x14bf   :  { %v876_v21 = vadd.f32 1.0, %v874_v50 }
0x14c1   :  { %1251 = vrcp.f32 %v876_v21  ;;  %v889_v57 = vand.u32 2147483648, %v876_v21  ;;  %v887_v59 = vand.u32 2147483647, %v876_v21  ;;  %vm883_vm4 = vweird.f32 %v876_v21 }
0x14c3   :  { %v890_v62 = vor.u32 1.1754944e-38, %v889_v57  ;;  %vm888_vm6 = vcmp.eq.f32.partialorder %v887_v59, 8.507059e+37 }
0x14c4   :  { %v871_v51 = vpop.f32.mrf.mxu2 }
0x14c5   :  { %v875_v52 = vmul.f32 %v871_v51, %v1636_v22 }
0x14c7   :  { %v1252_v53 = vpop.eup %1251  ;;  %v877_v54 = vadd.f32 1.0, %v875_v52 }
0x14c8   :  { %v879_v55 = vmul.f32 %v1252_v53, %v876_v21  ;;  %vm884_vm3 = vweird.f32 %v1252_v53 }
0x14c9   :  { %1253 = vrcp.f32 %v877_v54  ;;  %vm885_vm5 = vmor %vm883_vm4, %vm884_vm3  ;;  %v904_v10 = vand.u32 2147483648, %v877_v54  ;;  %v902_v37 = vand.u32 2147483647, %v877_v54  ;;  %vm898_vm8 = vweird.f32 %v877_v54 }
0x14ca   :  { %v880_v56 = vsub.f32 1.0, %v879_v55  ;;  %v1275_v55 = vld [vmem:[%s1773_s10] sm:$0x1f] }
0x14cb   :  { %v905_v6 = vor.u32 1.1754944e-38, %v904_v10  ;;  %vm903_vm10 = vcmp.eq.f32.partialorder %v902_v37, 8.507059e+37 }
0x14cc   :  { %v881_v58 = vmul.f32 %v1252_v53, %v880_v56  ;;  %v980_v56 = vperm.slane %v1275_v55, 4 }
0x14ce   :  { %v882_v60 = vadd.f32 %v1252_v53, %v881_v58 }
0x14cf   :  { %v1254_v61 = vpop.eup %1253 }
0x14d0   :  { %v886_v0 = vsel %vm885_vm5, %v1252_v53, %v882_v60  ;;  %v894_v4 = vmul.f32 %v1254_v61, %v877_v54  ;;  %vm899_vm7 = vweird.f32 %v1254_v61 }
0x14d1   :  { %v1639_v5 = vsel %vm888_vm6, %v890_v62, %v886_v0  ;;  %vm900_vm9 = vmor %vm898_vm8, %vm899_vm7  ;;  %v1276_v62 = vld [vmem:[%s1763_s0] sm:$0xff] }
0x14d2   :  { %v895_v8 = vsub.f32 1.0, %v894_v4  ;;  %1255 = vrsqrt.f32 %v1639_v5  ;;  %vm917_vm11 = vcmp.eq.f32.partialorder %v1639_v5, inf  ;;  %v920_v24 = vand.u32 2147483648, %v1639_v5 }
0x14d3   :  { %vm919_vm12 = vcmp.eq.f32.partialorder %v1639_v5, 0.0  ;;  %v1664_v30 = vmul.f32 %v1639_v5, %v816_v23 }
0x14d4   :  { %v896_v39 = vmul.f32 %v1254_v61, %v895_v8 }
0x14d6   :  { %v897_v1 = vadd.f32 %v1254_v61, %v896_v39 }
0x14d8   :  { %v1256_v2 = vpop.eup %1255  ;;  %v901_v11 = vsel %vm900_vm9, %v1254_v61, %v897_v1 }
0x14d9   :  { %v1642_v12 = vsel %vm903_vm10, %v905_v6, %v901_v11  ;;  %v911_v13 = vmul.f32 %v1256_v2, %v1639_v5 }
0x14da   :  { %1257 = vrsqrt.f32 %v1642_v12  ;;  %vm929_vm15 = vcmp.eq.f32.partialorder %v1642_v12, inf  ;;  %v932_v44 = vand.u32 2147483648, %v1642_v12  ;;  %vm931_vm1 = vcmp.eq.f32.partialorder %v1642_v12, 0.0 }
0x14db   :  { %v912_v14 = vmul.f32 %v1256_v2, %v911_v13  ;;  %v1700_v50 = vmul.f32 %v1642_v12, %v817_v46  ;;  %v1277_v13 = vld [vmem:[%s1763_s0 + $0x8] sm:$0xff] }
0x14dd   :  { %v913_v15 = vmul.f32 0.5, %v912_v14 }
0x14df   :  { %v914_v16 = vsub.f32 1.5, %v913_v15 }
0x14e0   :  { %v1258_v17 = vpop.eup %1257 }
0x14e1   :  { %v915_v20 = vmul.f32 %v1256_v2, %v914_v16  ;;  %v923_v38 = vmul.f32 %v1258_v17, %v1642_v12 }
0x14e3   :  { %v916_v7 = vmul.f32 %v915_v20, %v1639_v5  ;;  %v924_v18 = vmul.f32 %v1258_v17, %v923_v38 }
0x14e5   :  { %v918_v28 = vsel %vm917_vm11, %v1639_v5, %v916_v7  ;;  %v925_v29 = vmul.f32 0.5, %v924_v18 }
0x14e6   :  { %v921_v31 = vsel %vm919_vm12, %v920_v24, %v918_v28 }
0x14e7   :  { %v961_v32 = vmul.f32 %v955_v26, %v921_v31  ;;  %v926_v33 = vsub.f32 1.5, %v925_v29  ;;  %v963_v34 = vmul.f32 %v957_v27, %v921_v31  ;;  %v965_v9 = vmul.f32 %v959_v63, %v921_v31 }
0x14e9   :  { %v967_v36 = vadd.f32 %v961_v32, %v1664_v30  ;;  %v927_v40 = vmul.f32 %v1258_v17, %v926_v33  ;;  %v969_v41 = vadd.f32 %v963_v34, %v1664_v30  ;;  %v971_v42 = vadd.f32 %v965_v9, %v1664_v30 }
0x14ea   :  { %v934_v32 = vmul.f32 %v1664_v30, %v1664_v30  ;;  %v935_v34 = vmul.f32 %v1700_v50, %v1700_v50 }
0x14eb   :  { %973 = vst.msk [vmem:[%s1774_s11] sm:$0xff] %vm946_vm13, %v967_v36  ;;  %1168 = vmatmul.msk.f32.vlgmr.msrb.gmra.mxu0 %vm946_vm13, %v967_v36  ;;  %v928_v25 = vmul.f32 %v927_v40, %v1642_v12 }
0x14ec   :  { %975 = vst.msk [vmem:[%s1774_s11 + $0x10] sm:$0xff] %vm946_vm13, %v969_v41 }
0x14ed   :  { %v930_v48 = vsel %vm929_vm15, %v1642_v12, %v928_v25  ;;  %977 = vst.msk [vmem:[%s1774_s11 + $0x20] sm:$0xff] %vm946_vm13, %v971_v42 }
0x14ee   :  { %v933_v49 = vsel %vm931_vm1, %v932_v44, %v930_v48  ;;  %v936_v44 = vadd.f32 %v934_v32, %v1639_v5 }
0x14ef   :  { %v962_v21 = vmul.f32 %v956_v45, %v933_v49  ;;  %v964_v51 = vmul.f32 %v958_v3, %v933_v49  ;;  %v966_v52 = vmul.f32 %v960_v35, %v933_v49  ;;  %v937_v45 = vadd.f32 %v935_v34, %v1642_v12 }
0x14f1   :  { %v968_v53 = vadd.f32 %v962_v21, %v1700_v50  ;;  %v970_v22 = vadd.f32 %v964_v51, %v1700_v50  ;;  %v972_v54 = vadd.f32 %v966_v52, %v1700_v50 }
0x14f3   :  { %974 = vst.msk [vmem:[%s1774_s11 + $0x8] sm:$0xff] %vm946_vm13, %v968_v53  ;;  %1169 = vmatmul.msk.f32.gmra.mxu0 %vm946_vm13, %v968_v53  ;;  %1171 = vmatmul.msk.f32.vlgmr.msra.gmra.mxu3 %vm946_vm13, %v970_v22 }
0x14f4   :  { %976 = vst.msk [vmem:[%s1774_s11 + $0x18] sm:$0xff] %vm946_vm13, %v970_v22 }
0x14f5   :  { %978 = vst.msk [vmem:[%s1774_s11 + $0x28] sm:$0xff] %vm946_vm13, %v972_v54 }
0x14fb   :  { %1170 = vmatmul.msk.f32.gmra.mxu0 %vm946_vm13, %v969_v41  ;;  %1172 = vmatmul.msk.f32.gmra.mxu3 %vm946_vm13, %v971_v42 }
0x1503   :  { %1173 = vmatmul.msk.f32.gmra.mxu3 %vm946_vm13, %v972_v54  ;;  %v1100_v54 = vmul.f32 %v1632_v47, %v1632_v47 }
0x1505   :  { %v1101_v55 = vsel %vm58_vm0, %v1100_v54, 0.0 }
0x1568   :  { %v1016_v57 = vpop.f32.mrf.mxu0 }
0x1569   :  { %v1017_v58 = vadd.f32 %v1016_v57, %v980_v56 }
0x156b   :  { %v1040_v59 = vmul.f32 1.442695, %v1017_v58  ;;  %v1034_v0 = vmul.f32 %v1276_v62, %v1017_v58 }
0x156d   :  { %1259 = vpow2.f32 %v1040_v59 }
0x1570   :  { %v1019_v60 = vpop.f32.mrf.mxu0 }
0x1571   :  { %v1020_v61 = vadd.f32 %v1019_v60, %v980_v56 }
0x1573   :  { %v1260_v4 = vpop.eup %1259  ;;  %v1042_v8 = vmul.f32 1.442695, %v1020_v61  ;;  %v1035_v14 = vmul.f32 %v1277_v13, %v1020_v61 }
0x1574   :  { %v1052_v10 = vsub.f32 %v1034_v0, %v1260_v4 }
0x1575   :  { %1261 = vpow2.f32 %v1042_v8 }
0x1576   :  { %v1025_v39 = vpop.f32.mrf.mxu3  ;;  %v1058_v37 = vsel %vm58_vm0, %v1052_v10, 0.0 }
0x1577   :  { %v1026_v1 = vadd.f32 %v1025_v39, %v980_v56  ;;  %1059 = vadd.xlane.f32.xlu0 %v1058_v37 }
0x1578   :  { %v1022_v6 = vpop.f32.mrf.mxu0 }
0x1579   :  { %v1046_v2 = vmul.f32 1.442695, %v1026_v1  ;;  %v1023_v11 = vadd.f32 %v1022_v6, %v980_v56  ;;  %v1037_v7 = vmul.f32 %v1277_v13, %v1026_v1 }
0x157b   :  { %v1262_v15 = vpop.eup %1261  ;;  %1263 = vpow2.f32 %v1046_v2  ;;  %v1044_v16 = vmul.f32 1.442695, %v1023_v11  ;;  %v1036_v29 = vmul.f32 %v1276_v62, %v1023_v11 }
0x157c   :  { %v1053_v17 = vsub.f32 %v1035_v14, %v1262_v15  ;;  %1265 = vlog2.f32 %v1639_v5 }
0x157d   :  { %1267 = vpow2.f32 %v1044_v16 }
0x157e   :  { %v1028_v19 = vpop.f32.mrf.mxu3  ;;  %v1061_v20 = vsel %vm58_vm0, %v1053_v17, 0.0  ;;  %1269 = vlog2.f32 %v1642_v12 }
0x157f   :  { %v1029_v38 = vadd.f32 %v1028_v19, %v980_v56  ;;  %1062 = vadd.xlane.f32.xlu1 %v1061_v20 }
0x1581   :  { %v1264_v18 = vpop.eup %1263  ;;  %v1048_v23 = vmul.f32 1.442695, %v1029_v38  ;;  %v1038_v9 = vmul.f32 %v1276_v62, %v1029_v38 }
0x1582   :  { %v1055_v24 = vsub.f32 %v1037_v7, %v1264_v18  ;;  %v1266_v26 = vpop.eup %1265 }
0x1583   :  { %1271 = vpow2.f32 %v1048_v23  ;;  %v1268_v63 = vpop.eup %1267  ;;  %v939_v40 = vmul.f32 0.6931472, %v1266_v26 }
0x1584   :  { %v1067_v27 = vsel %vm58_vm0, %v1055_v24, 0.0  ;;  %v1270_v28 = vpop.eup %1269  ;;  %v1054_v36 = vsub.f32 %v1036_v29, %v1268_v63 }
0x1585   :  { %1068 = vadd.xlane.f32.xlu2 %v1067_v27  ;;  %v941_v43 = vmul.f32 0.6931472, %v1270_v28  ;;  %v942_v46 = vsub.f32 %v936_v44, %v939_v40 }
0x1586   :  { %v1031_v31 = vpop.f32.mrf.mxu3  ;;  %v1064_v35 = vsel %vm58_vm0, %v1054_v36, 0.0 }
0x1587   :  { %v1032_v33 = vadd.f32 %v1031_v31, %v980_v56  ;;  %v943_v48 = vsub.f32 %v937_v45, %v941_v43  ;;  %v1166_v21 = vadd.f32 -1.0, %v942_v46 }
0x1589   :  { %v1272_v41 = vpop.eup %1271  ;;  %v1050_v42 = vmul.f32 1.442695, %v1032_v33  ;;  %v1039_v49 = vmul.f32 %v1277_v13, %v1032_v33  ;;  %v1167_v52 = vadd.f32 -1.0, %v943_v48  ;;  %v947_v22 = vsel %vm946_vm13, %v1166_v21, 0.0 }
0x158a   :  { %v1056_v25 = vsub.f32 %v1038_v9, %v1272_v41 }
0x158b   :  { %1273 = vpow2.f32 %v1050_v42  ;;  %v950_v12 = vsel %vm946_vm13, %v1167_v52, 0.0 }
0x158c   :  { %v1070_v3 = vsel %vm58_vm0, %v1056_v25, 0.0 }
0x158d   :  { %1071 = vadd.xlane.f32.xlu0 %v1070_v3  ;;  %1065 = vadd.xlane.f32.xlu2 %v1064_v35 }
0x1591   :  { %v1274_v51 = vpop.eup %1273 }
0x1592   :  { %v1057_v53 = vsub.f32 %v1039_v49, %v1274_v51 }
0x1594   :  { %v1073_v5 = vsel %vm58_vm0, %v1057_v53, 0.0  ;;  %vm1113_vm0 = vcmask 0  }
0x1595   :  { %948 = vadd.xlane.f32.xlu2 %v947_v22  ;;  %1074 = vadd.xlane.f32.xlu1 %v1073_v5 }
0x1596   :  { %951 = vadd.xlane.f32.xlu0 %v950_v12 }
0x159d   :  { %1102 = vadd.xlane.f32.xlu1 %v1101_v55 }
0x15ea   :  { %v1060_v56 = vpop.xlane.xlu0 %1059 }
0x15f2   :  { %v1063_v58 = vpop.xlane.xlu1 %1062 }
0x15f8   :  { %v1069_v57 = vpop.xlane.xlu2 %1068 }
0x15f9   :  { %v1077_v0 = vadd.f32 %v1069_v57, %v1063_v58 }
0x1600   :  { %v1066_v59 = vpop.xlane.xlu2 %1065  ;;  %v1072_v60 = vpop.xlane.xlu0 %1071 }
0x1601   :  { %v1076_v61 = vadd.f32 %v1066_v59, %v1060_v56 }
0x1603   :  { %v1078_v62 = vadd.f32 %v1076_v61, %v1072_v60 }
0x1605   :  { %v1080_v1 = vmul.f32 0.33333334, %v1078_v62 }
0x1608   :  { %v949_v4 = vpop.xlane.xlu2 %948  ;;  %v1075_v8 = vpop.xlane.xlu1 %1074 }
0x1609   :  { %v953_v10 = vmul.f32 0.5, %v949_v4  ;;  %v1079_v39 = vadd.f32 %v1077_v0, %v1075_v8  ;;  %v952_v37 = vpop.xlane.xlu0 %951 }
0x160a   :  { %v954_v47 = vmul.f32 0.5, %v952_v37 }
0x160b   :  { %v1082_v6 = vsel %vm946_vm13, %v1664_v30, %v953_v10  ;;  %v1081_v2 = vmul.f32 0.33333334, %v1079_v39  ;;  %v1090_v14 = vsub.f32 %v953_v10, %v1080_v1 }
0x160c   :  { %v1085_v11 = vsel %vm1084_vm2, %v1082_v6, %v1080_v1  ;;  %v1083_v13 = vsel %vm946_vm13, %v1700_v50, %v954_v47 }
0x160d   :  { %1088 = vst.msk [vmem:[%s1775_s12] sm:$0xff] %vm1087_vm14, %v1085_v11  ;;  %v1086_v15 = vsel %vm1084_vm2, %v1083_v13, %v1081_v2  ;;  %v1091_v16 = vsub.f32 %v954_v47, %v1081_v2 }
0x160e   :  { %1089 = vst.msk [vmem:[%s1775_s12 + $0x8] sm:$0xff] %vm1087_vm14, %v1086_v15  ;;  %s1126_s12 = sshll.u32 %s1776_s13, 4  ;;  %s1127_s12 = int_to_ptr.hbm [resolvable:$true] %s1126_s12 }
0x160f   :  { %v1092_v17 = vadd.f32 %v1091_v16, %v1090_v14 }
0x1610   :  { %v1103_v19 = vpop.xlane.xlu1 %1102 }
0x1611   :  { %v1093_v20 = vrot.slane %v1092_v17, 4  ;;  %v1104_v30 = vrot.slane %v1103_v19, 4 }
0x1613   :  { %v1094_v38 = vadd.f32 %v1093_v20, %v1092_v17  ;;  %v1105_v7 = vadd.f32 %v1104_v30, %v1103_v19 }
0x1615   :  { %v1095_v18 = vrot.slane %v1094_v38, 2  ;;  %v1106_v23 = vrot.slane %v1105_v7, 2 }
0x1617   :  { %v1096_v50 = vadd.f32 %v1095_v18, %v1094_v38  ;;  %v1107_v24 = vadd.f32 %v1106_v23, %v1105_v7 }
0x1619   :  { %v1097_v26 = vrot.slane %v1096_v50, 1  ;;  %v1108_v27 = vrot.slane %v1107_v24, 1 }
0x161b   :  { %v1109_v63 = vadd.f32 %v1108_v27, %v1107_v24  ;;  %v1098_v28 = vadd.f32 %v1097_v26, %v1096_v50 }
0x161d   :  { %v1111_v29 = vmul.f32 0.1, %v1109_v63  ;;  %v1110_v31 = vmul.f32 0.5, %v1098_v28 }
0x161f   :  { %v1112_v32 = vadd.f32 %v1111_v29, %v1110_v31 }
0x1621   :  { %1114 = vst.msk [vmem:[#allocation2] sm:$0x1] %vm1113_vm0, %v1112_v32 }
0x1622   :  { %1129 = dma.vmem_to_hbm [thread:$0]  %s1125_s7, 16, %s1127_s12, [#allocation3]  }
0x1623   :  { %1302 = dma.done.wait [#allocation3], 16  }
0x1624   :  { %1303 = vsyncadd [#allocation3], 4294967280 }
0x1625   :  { %1138 = vsyncpa [#allocation3], 1 }

</bundles_post_ra>
